<compile_context>
chip_gen: v7x
topology: tpu7x:2x2x1
jax: 0.10.0
libtpu: 0.0.40
codegen_flags: <defaults>
</compile_context>

<pallas_src>
from functools import partial

import jax
import jax.numpy as jnp
from jax.experimental import pallas as pl
from jax.experimental.pallas import tpu as pltpu

EPS = 1e-5


# ------------------------------ fused kernel --------------------------------


def _make_fused_kernel(N, L, rpn, hidden):
    """Builds the fused forward kernel for static (N, L, rpn, hidden)."""
    NL = N * L
    C1, C2, C3 = 16, 32, 64
    J = rpn * hidden

    def kernel(x_ref, w1_ref, w2_ref, w3_ref, w1e_ref, s2_ref, vecs_ref,
               out_ref, h_scr):
        f32 = jnp.float32
        bf16 = jnp.bfloat16

        # Boundary masks for the +/-1 sequence shifts (computed once, reused by
        # all three conv layers).  They zero both the conv zero-padding taps and
        # the cross-sample wrap-around of the sublane rolls.
        pos = jax.lax.broadcasted_iota(jnp.int32, (NL, 1), 0) % L
        mask_d = (pos > 0).astype(f32)        # row has a left  neighbour (l > 0)
        mask_u = (pos < L - 1).astype(f32)    # row has a right neighbour (l < L-1)

        def conv_bn_relu(h_bf16, w_ref, cout, gamma, beta):
            # Conv1d(k=3, padding=1) in NLC layout: ONE tap-concatenated MXU
            # matmul, then +/-1 sublane rolls (XLU) + boundary masks (VPU).
            # Conv bias omitted: training-mode BN mean subtraction cancels it.
            ycat = jnp.dot(h_bf16, w_ref[...],
                           preferred_element_type=f32)          # (NL, 3*cout) f32
            y0 = ycat[:, 0:cout]
            y1 = ycat[:, cout:2 * cout]
            y2 = ycat[:, 2 * cout:3 * cout]
            acc = (y1
                   + mask_d * pltpu.roll(y0, shift=1, axis=0)        # y0[i-1]
                   + mask_u * pltpu.roll(y2, shift=NL - 1, axis=0))  # y2[i+1]
            # Fused training-mode BatchNorm1d (batch stats, biased variance):
            # one stats pass + one FMA pass, all in f32.
            inv_n = 1.0 / NL
            mean = jnp.sum(acc, axis=0, keepdims=True) * inv_n
            mean_sq = jnp.sum(acc * acc, axis=0, keepdims=True) * inv_n
            var = jnp.maximum(mean_sq - mean * mean, 0.0)        # clamp (review)
            scale = gamma * jax.lax.rsqrt(var + EPS)
            shift = beta - mean * scale
            return jnp.maximum(acc * scale + shift, 0.0)         # ReLU, f32

        x = x_ref[...]                                           # (NL, 128) bf16
        h1 = conv_bn_relu(x, w1_ref, C1,
                          vecs_ref[0:1, 0:C1], vecs_ref[1:2, 0:C1])
        h2 = conv_bn_relu(h1.astype(bf16), w2_ref, C2,
                          vecs_ref[2:3, 0:C2], vecs_ref[3:4, 0:C2])
        h3 = conv_bn_relu(h2.astype(bf16), w3_ref, C3,
                          vecs_ref[4:5, 0:C3], vecs_ref[5:6, 0:C3])

        # view(160,-1) + fc1, fused into ONE matmul: the NCL-flatten permutation
        # is baked into the pre-expanded weight w1e (L*64, rpn*hidden).  The
        # sublane->lane relayout (N*L, 64) -> (N, L*64) is a scratch store plus
        # L lane-concatenated reads (XLU/VPU work, no extra MXU pushes).
        h_scr[...] = h3.reshape(N, L, C3)
        H = jnp.concatenate([h_scr[:, l, :] for l in range(L)], axis=1)  # (N, L*64)
        z = jnp.dot(H.astype(bf16), w1e_ref[...],
                    preferred_element_type=f32)                  # (N, rpn*hidden)
        z = jnp.maximum(z + vecs_ref[6:7, 0:J], 0.0)             # fc1 bias + ReLU

        # fc2 via a block-diagonal selection matrix + bias + sigmoid; the
        # (N, rpn) result's row-major flatten equals the PyTorch (160, 1) output.
        o = jnp.dot(z.astype(bf16), s2_ref[...], preferred_element_type=f32)
        o = o + vecs_ref[7:8, 0:1]                               # fc2 bias (scalar)
        out_ref[...] = pl.reciprocal(1.0 + jnp.exp(-o), approx=True)   # sigmoid

    return kernel


# ------------------------- one-time parameter packing ------------------------


def prepack_params(params, N, L):
    """Hoists all weight/constant expansion out of the per-call path."""
    f32, bf16 = jnp.float32, jnp.bfloat16
    assert 160 % N == 0, "view(160,-1) rows must not straddle samples"
    rpn = 160 // N                       # rows per sample in the flatten
    assert 64 % rpn == 0, "view(160,-1) rows must align with channel boundaries"
    cpr = 64 // rpn                      # channels per flattened row
    hidden = params["fw1"].shape[1]
    assert params["fw1"].shape[0] == cpr * L
    J = rpn * hidden
    W = max(J, 64)                       # lane width of the packed vector slab

    # Tap-concatenated conv weights (Cin, 3*Cout), bf16 MXU operands.
    w1c = jnp.concatenate([params["w1"][k] for k in range(3)], axis=1).astype(bf16)
    w2c = jnp.concatenate([params["w2"][k] for k in range(3)], axis=1).astype(bf16)
    w3c = jnp.concatenate([params["w3"][k] for k in range(3)], axis=1).astype(bf16)

    # fc1 expanded so it consumes the conv output directly in (N, L*64) layout:
    # w1e[l*64 + c, g*hidden + o] = fw1[(c - cpr*g)*L + l, o] iff cpr*g <= c < cpr*(g+1).
    blk = jnp.transpose(params["fw1"].reshape(cpr, L, hidden), (1, 0, 2))  # [l, cc, o]
    eyeg = jnp.eye(rpn, dtype=f32)
    w1e = jnp.einsum("lco,Gg->lGcgo", blk, eyeg).reshape(L * 64, J).astype(bf16)
    fb1e = jnp.tile(params["fb1"].reshape(-1), rpn)                        # (J,)

    # fc2 folded into a block-diagonal selection matrix over the (row, hidden)
    # column blocks of z.
    s2 = jnp.einsum("o,Gg->Gog", params["fw2"][:, 0], eyeg).reshape(J, rpn).astype(bf16)

    # Pack gamma/beta/biases into one lane-dense (8, W) f32 slab (1 DMA).
    def row(v):
        v = jnp.asarray(v, f32).reshape(-1)
        return jnp.pad(v, (0, W - v.shape[0]))

    vecs = jnp.stack([row(params["g1"]), row(params["be1"]),
                      row(params["g2"]), row(params["be2"]),
                      row(params["g3"]), row(params["be3"]),
                      row(fb1e), row(params["fb2"])])             # (8, W) f32

    return dict(w1c=w1c, w2c=w2c, w3c=w3c, w1e=w1e, s2=s2, vecs=vecs,
                rpn=rpn, hidden=hidden)


# -------------------------------- forward ------------------------------------


@partial(jax.jit, static_argnames=("rpn", "hidden"))
def _forward(x_ncl, w1c, w2c, w3c, w1e, s2, vecs, *, rpn, hidden):
    N, C, L = x_ncl.shape
    assert C == 128 and (N * 64 * L) % 160 == 0
    NL = N * L

    # NCL -> NLC, flattened to (N*L, 128) so channels sit on the 128-wide lanes.
    x_flat = jnp.transpose(x_ncl, (0, 2, 1)).astype(jnp.bfloat16).reshape(NL, C)

    vmem = pl.BlockSpec(memory_space=pltpu.MemorySpace.VMEM)
    out = pl.pallas_call(
        _make_fused_kernel(N, L, rpn, hidden),
        out_shape=jax.ShapeDtypeStruct((N, rpn), jnp.float32),
        in_specs=[vmem] * 7,
        out_specs=vmem,
        scratch_shapes=[pltpu.VMEM((N, L, 64), jnp.float32)],
    )(x_flat, w1c, w2c, w3c, w1e, s2, vecs)
    # TODO(synk): on v7x, batch independent forwards along a leading "parallel"
    # grid axis to use both TensorCores; a single gridless call occupies one TC.
    # TODO(synk): on v5e, the 256 KiB w1e DMA could be overlapped with the conv
    # stack (memory_space=pl.ANY + pltpu.make_async_copy, wait before fc1).
    return out.reshape(160, 1)


def relation_function_forward(x_ncl, packed):
    return _forward(x_ncl, packed["w1c"], packed["w2c"], packed["w3c"],
                    packed["w1e"], packed["s2"], packed["vecs"],
                    rpn=packed["rpn"], hidden=packed["hidden"])


# --------------------------- reference (plain JAX) ---------------------------


def ref_forward(x_ncl, params):
    hp = jax.lax.Precision.HIGHEST
    x = jnp.transpose(x_ncl, (0, 2, 1)).astype(jnp.float32)

    def block(x, w, b, g, be):
        N, L, Cin = x.shape
        xp = jnp.pad(x, ((0, 0), (1, 1), (0, 0)))
        acc = sum(
            jnp.einsum("nlc,cd->nld", xp[:, k:k + L, :], w[k], precision=hp)
            for k in range(3)
        ) + b[0]
        flat = acc.reshape(N * L, -1)
        mean = flat.mean(0)
        var = ((flat - mean) ** 2).mean(0)
        flat = (flat - mean) / jnp.sqrt(var + EPS) * g[0] + be[0]
        return jnp.maximum(flat, 0.0).reshape(N, L, -1)

    h = block(x, params["w1"], params["b1"], params["g1"], params["be1"])
    h = block(h, params["w2"], params["b2"], params["g2"], params["be2"])
    h = block(h, params["w3"], params["b3"], params["g3"], params["be3"])
    h = jnp.transpose(h, (0, 2, 1)).reshape(160, -1)
    z = jnp.maximum(jnp.dot(h, params["fw1"], precision=hp) + params["fb1"][0], 0.0)
    z = jnp.dot(z, params["fw2"], precision=hp) + params["fb2"][0]
    return jax.nn.sigmoid(z)


# --------------------------------- main --------------------------------------


def make_params(key, input_size, hidden_size):
    ks = jax.random.split(key, 8)
    p = {}
    # conv weights stored as (kernel=3, Cin, Cout); PyTorch's (Cout, Cin, 3)
    # is a transposed view of the same parameters.  Conv biases are used only
    # by the reference (the kernel drops them: training-mode BN cancels them).
    p["w1"] = 0.05 * jax.random.normal(ks[0], (3, 128, 16), jnp.float32)
    p["b1"] = 0.05 * jax.random.normal(ks[1], (1, 16), jnp.float32)
    p["g1"] = jnp.ones((1, 16), jnp.float32)
    p["be1"] = jnp.zeros((1, 16), jnp.float32)
    p["w2"] = 0.05 * jax.random.normal(ks[2], (3, 16, 32), jnp.float32)
    p["b2"] = 0.05 * jax.random.normal(ks[3], (1, 32), jnp.float32)
    p["g2"] = jnp.ones((1, 32), jnp.float32)
    p["be2"] = jnp.zeros((1, 32), jnp.float32)
    p["w3"] = 0.05 * jax.random.normal(ks[4], (3, 32, 64), jnp.float32)
    p["b3"] = 0.05 * jax.random.normal(ks[5], (1, 64), jnp.float32)
    p["g3"] = jnp.ones((1, 64), jnp.float32)
    p["be3"] = jnp.zeros((1, 64), jnp.float32)
    # fc weights stored already transposed: (in, out)
    p["fw1"] = 0.1 * jax.random.normal(ks[6], (input_size, hidden_size), jnp.float32)
    p["fb1"] = jnp.zeros((1, hidden_size), jnp.float32)
    p["fw2"] = 0.1 * jax.random.normal(ks[7], (hidden_size, 1), jnp.float32)
    p["fb2"] = jnp.zeros((1, 1), jnp.float32)
    return p


if __name__ == "__main__":
    # Small shapes consistent with the module: x is (N, 128, L) NCL;
    # out.view(160, -1) requires N*64*L % 160 == 0.  N=10, L=8 -> input_size=32.
    N, L = 10, 8
    input_size = (N * 64 * L) // 160     # 32
    hidden_size = 16

    key = jax.random.PRNGKey(0)
    kx, kp = jax.random.split(key)
    x = jax.random.normal(kx, (N, 128, L), jnp.float32)
    params = make_params(kp, input_size, hidden_size)

    packed = prepack_params(params, N, L)      # one-time, hoisted out of per-call path
    out = relation_function_forward(x, packed)
    out = jax.block_until_ready(out)
    assert out.shape == (160, 1) and out.dtype == jnp.float32

    ref = ref_forward(x, params)
    # Tolerance sized for bf16 MXU operands (all accumulation, BN statistics,
    # scale/shift and the sigmoid epilogue are kept in f32).
    assert jnp.allclose(out, ref, rtol=2e-3, atol=2e-3), "mismatch vs reference"

    print("KERNEL_OK")
</pallas_src>

<mosaic_0001>
module attributes {stable_mosaic.version = 11 : i64} {
  func.func @kernel(%arg0: memref<80x128xbf16, #tpu.memory_space<vmem>>, %arg1: memref<128x48xbf16, #tpu.memory_space<vmem>>, %arg2: memref<16x96xbf16, #tpu.memory_space<vmem>>, %arg3: memref<32x192xbf16, #tpu.memory_space<vmem>>, %arg4: memref<512x256xbf16, #tpu.memory_space<vmem>>, %arg5: memref<256x16xbf16, #tpu.memory_space<vmem>>, %arg6: memref<8x256xf32, #tpu.memory_space<vmem>>, %arg7: memref<10x16xf32, #tpu.memory_space<vmem>>, %arg8: memref<10x8x64xf32, #tpu.memory_space<vmem>>) attributes {dimension_semantics = [], scalar_prefetch = 0 : i64, scratch_operands = 1 : i64, tpu.core_type = #tpu.core_type<tc>} {
    %0 = tpu.iota {dimensions = array<i32: 0>} : vector<80x1xi32>
    %c8_i32 = arith.constant 8 : i32
    %c0_i32 = arith.constant 0 : i32
    %1 = arith.cmpi eq, %c8_i32, %c0_i32 : i32
    %c1_i32 = arith.constant 1 : i32
    %2 = arith.select %1, %c1_i32, %c8_i32 : i32
    %3 = vector.broadcast %2 : i32 to vector<80x1xi32>
    %4 = arith.remsi %0, %3 : vector<80x1xi32>
    %c0_i32_0 = arith.constant 0 : i32
    %5 = vector.broadcast %c0_i32_0 : i32 to vector<80x1xi32>
    %6 = arith.cmpi ne, %4, %5 : vector<80x1xi32>
    %c0_i32_1 = arith.constant 0 : i32
    %7 = vector.broadcast %c0_i32_1 : i32 to vector<80x1xi32>
    %8 = arith.cmpi slt, %4, %7 : vector<80x1xi32>
    %c0_i32_2 = arith.constant 0 : i32
    %9 = arith.cmpi slt, %2, %c0_i32_2 : i32
    %10 = vector.broadcast %9 : i1 to vector<80x1xi1>
    %11 = vector.broadcast %10 : vector<80x1xi1> to vector<80x1xi1>
    %12 = arith.xori %8, %11 : vector<80x1xi1>
    %13 = arith.andi %12, %6 : vector<80x1xi1>
    %14 = vector.broadcast %2 : i32 to vector<80x1xi32>
    %15 = arith.addi %4, %14 : vector<80x1xi32>
    %16 = arith.select %13, %15, %4 : vector<80x1xi1>, vector<80x1xi32>
    %c0_i32_3 = arith.constant 0 : i32
    %17 = vector.broadcast %c0_i32_3 : i32 to vector<80x1xi32>
    %18 = arith.cmpi sgt, %16, %17 : vector<80x1xi32>
    %19 = arith.extui %18 : vector<80x1xi1> to vector<80x1xi32>
    %20 = arith.sitofp %19 : vector<80x1xi32> to vector<80x1xf32>
    %c7_i32 = arith.constant 7 : i32
    %21 = vector.broadcast %c7_i32 : i32 to vector<80x1xi32>
    %22 = arith.cmpi slt, %16, %21 : vector<80x1xi32>
    %23 = arith.extui %22 : vector<80x1xi1> to vector<80x1xi32>
    %24 = arith.sitofp %23 : vector<80x1xi32> to vector<80x1xf32>
    %c0 = arith.constant 0 : index
    %c0_4 = arith.constant 0 : index
    %25 = vector.load %arg0[%c0, %c0_4] : memref<80x128xbf16, #tpu.memory_space<vmem>>, vector<80x128xbf16>
    %c0_5 = arith.constant 0 : index
    %c0_6 = arith.constant 0 : index
    %26 = vector.load %arg6[%c0_5, %c0_6] : memref<8x256xf32, #tpu.memory_space<vmem>>, vector<1x16xf32>
    %c1 = arith.constant 1 : index
    %c0_7 = arith.constant 0 : index
    %27 = vector.load %arg6[%c1, %c0_7] : memref<8x256xf32, #tpu.memory_space<vmem>>, vector<1x16xf32>
    %c0_8 = arith.constant 0 : index
    %c0_9 = arith.constant 0 : index
    %28 = vector.load %arg1[%c0_8, %c0_9] : memref<128x48xbf16, #tpu.memory_space<vmem>>, vector<128x48xbf16>
    %cst = arith.constant dense<0.000000e+00> : vector<80x48xf32>
    %29 = tpu.matmul %25, %28, %cst {dimension_numbers = #tpu.dot_dimension_numbers<[1], [0], [0], [1], [0, 0, 1, 1], [], []>} : vector<80x128xbf16>, vector<128x48xbf16>, vector<80x48xf32> -> vector<80x48xf32>
    %30 = vector.extract_strided_slice %29 {offsets = [0, 0], sizes = [80, 16], strides = [1, 1]} : vector<80x48xf32> to vector<80x16xf32>
    %31 = vector.extract_strided_slice %29 {offsets = [0, 16], sizes = [80, 16], strides = [1, 1]} : vector<80x48xf32> to vector<80x16xf32>
    %32 = vector.extract_strided_slice %29 {offsets = [0, 32], sizes = [80, 16], strides = [1, 1]} : vector<80x48xf32> to vector<80x16xf32>
    %c1_i32_10 = arith.constant 1 : i32
    %33 = tpu.dynamic_rotate %30 by %c1_i32_10 dim 0 : vector<80x16xf32>, i32 -> vector<80x16xf32>
    %34 = vector.broadcast %20 : vector<80x1xf32> to vector<80x16xf32>
    %35 = arith.mulf %34, %33 : vector<80x16xf32>
    %36 = arith.addf %31, %35 : vector<80x16xf32>
    %c79_i32 = arith.constant 79 : i32
    %37 = tpu.dynamic_rotate %32 by %c79_i32 dim 0 : vector<80x16xf32>, i32 -> vector<80x16xf32>
    %38 = vector.broadcast %24 : vector<80x1xf32> to vector<80x16xf32>
    %39 = arith.mulf %38, %37 : vector<80x16xf32>
    %40 = arith.addf %36, %39 : vector<80x16xf32>
    %cst_11 = arith.constant dense<0.000000e+00> : vector<16xf32>
    %41 = vector.multi_reduction <add>, %40, %cst_11 [0] : vector<80x16xf32> to vector<16xf32>
    %42 = vector.shape_cast %41 : vector<16xf32> to vector<1x16xf32>
    %cst_12 = arith.constant 1.250000e-02 : f32
    %43 = vector.broadcast %cst_12 : f32 to vector<1x16xf32>
    %44 = arith.mulf %42, %43 : vector<1x16xf32>
    %45 = arith.mulf %40, %40 : vector<80x16xf32>
    %cst_13 = arith.constant dense<0.000000e+00> : vector<16xf32>
    %46 = vector.multi_reduction <add>, %45, %cst_13 [0] : vector<80x16xf32> to vector<16xf32>
    %47 = vector.shape_cast %46 : vector<16xf32> to vector<1x16xf32>
    %cst_14 = arith.constant 1.250000e-02 : f32
    %48 = vector.broadcast %cst_14 : f32 to vector<1x16xf32>
    %49 = arith.mulf %47, %48 : vector<1x16xf32>
    %50 = arith.mulf %44, %44 : vector<1x16xf32>
    %51 = arith.subf %49, %50 : vector<1x16xf32>
    %cst_15 = arith.constant 0.000000e+00 : f32
    %52 = vector.broadcast %cst_15 : f32 to vector<1x16xf32>
    %53 = arith.maximumf %51, %52 : vector<1x16xf32>
    %cst_16 = arith.constant 9.99999974E-6 : f32
    %54 = vector.broadcast %cst_16 : f32 to vector<1x16xf32>
    %55 = arith.addf %53, %54 : vector<1x16xf32>
    %56 = math.rsqrt %55 : vector<1x16xf32>
    %57 = arith.mulf %26, %56 : vector<1x16xf32>
    %58 = arith.mulf %44, %57 : vector<1x16xf32>
    %59 = arith.subf %27, %58 : vector<1x16xf32>
    %60 = vector.broadcast %57 : vector<1x16xf32> to vector<80x16xf32>
    %61 = arith.mulf %40, %60 : vector<80x16xf32>
    %62 = vector.broadcast %59 : vector<1x16xf32> to vector<80x16xf32>
    %63 = arith.addf %61, %62 : vector<80x16xf32>
    %cst_17 = arith.constant 0.000000e+00 : f32
    %64 = vector.broadcast %cst_17 : f32 to vector<80x16xf32>
    %65 = arith.maximumf %63, %64 : vector<80x16xf32>
    %66 = arith.truncf %65 : vector<80x16xf32> to vector<80x16xbf16>
    %c2 = arith.constant 2 : index
    %c0_18 = arith.constant 0 : index
    %67 = vector.load %arg6[%c2, %c0_18] : memref<8x256xf32, #tpu.memory_space<vmem>>, vector<1x32xf32>
    %c3 = arith.constant 3 : index
    %c0_19 = arith.constant 0 : index
    %68 = vector.load %arg6[%c3, %c0_19] : memref<8x256xf32, #tpu.memory_space<vmem>>, vector<1x32xf32>
    %c0_20 = arith.constant 0 : index
    %c0_21 = arith.constant 0 : index
    %69 = vector.load %arg2[%c0_20, %c0_21] : memref<16x96xbf16, #tpu.memory_space<vmem>>, vector<16x96xbf16>
    %cst_22 = arith.constant dense<0.000000e+00> : vector<80x96xf32>
    %70 = tpu.matmul %66, %69, %cst_22 {dimension_numbers = #tpu.dot_dimension_numbers<[1], [0], [0], [1], [0, 0, 1, 1], [], []>} : vector<80x16xbf16>, vector<16x96xbf16>, vector<80x96xf32> -> vector<80x96xf32>
    %71 = vector.extract_strided_slice %70 {offsets = [0, 0], sizes = [80, 32], strides = [1, 1]} : vector<80x96xf32> to vector<80x32xf32>
    %72 = vector.extract_strided_slice %70 {offsets = [0, 32], sizes = [80, 32], strides = [1, 1]} : vector<80x96xf32> to vector<80x32xf32>
    %73 = vector.extract_strided_slice %70 {offsets = [0, 64], sizes = [80, 32], strides = [1, 1]} : vector<80x96xf32> to vector<80x32xf32>
    %c1_i32_23 = arith.constant 1 : i32
    %74 = tpu.dynamic_rotate %71 by %c1_i32_23 dim 0 : vector<80x32xf32>, i32 -> vector<80x32xf32>
    %75 = vector.broadcast %20 : vector<80x1xf32> to vector<80x32xf32>
    %76 = arith.mulf %75, %74 : vector<80x32xf32>
    %77 = arith.addf %72, %76 : vector<80x32xf32>
    %c79_i32_24 = arith.constant 79 : i32
    %78 = tpu.dynamic_rotate %73 by %c79_i32_24 dim 0 : vector<80x32xf32>, i32 -> vector<80x32xf32>
    %79 = vector.broadcast %24 : vector<80x1xf32> to vector<80x32xf32>
    %80 = arith.mulf %79, %78 : vector<80x32xf32>
    %81 = arith.addf %77, %80 : vector<80x32xf32>
    %cst_25 = arith.constant dense<0.000000e+00> : vector<32xf32>
    %82 = vector.multi_reduction <add>, %81, %cst_25 [0] : vector<80x32xf32> to vector<32xf32>
    %83 = vector.shape_cast %82 : vector<32xf32> to vector<1x32xf32>
    %cst_26 = arith.constant 1.250000e-02 : f32
    %84 = vector.broadcast %cst_26 : f32 to vector<1x32xf32>
    %85 = arith.mulf %83, %84 : vector<1x32xf32>
    %86 = arith.mulf %81, %81 : vector<80x32xf32>
    %cst_27 = arith.constant dense<0.000000e+00> : vector<32xf32>
    %87 = vector.multi_reduction <add>, %86, %cst_27 [0] : vector<80x32xf32> to vector<32xf32>
    %88 = vector.shape_cast %87 : vector<32xf32> to vector<1x32xf32>
    %cst_28 = arith.constant 1.250000e-02 : f32
    %89 = vector.broadcast %cst_28 : f32 to vector<1x32xf32>
    %90 = arith.mulf %88, %89 : vector<1x32xf32>
    %91 = arith.mulf %85, %85 : vector<1x32xf32>
    %92 = arith.subf %90, %91 : vector<1x32xf32>
    %cst_29 = arith.constant 0.000000e+00 : f32
    %93 = vector.broadcast %cst_29 : f32 to vector<1x32xf32>
    %94 = arith.maximumf %92, %93 : vector<1x32xf32>
    %cst_30 = arith.constant 9.99999974E-6 : f32
    %95 = vector.broadcast %cst_30 : f32 to vector<1x32xf32>
    %96 = arith.addf %94, %95 : vector<1x32xf32>
    %97 = math.rsqrt %96 : vector<1x32xf32>
    %98 = arith.mulf %67, %97 : vector<1x32xf32>
    %99 = arith.mulf %85, %98 : vector<1x32xf32>
    %100 = arith.subf %68, %99 : vector<1x32xf32>
    %101 = vector.broadcast %98 : vector<1x32xf32> to vector<80x32xf32>
    %102 = arith.mulf %81, %101 : vector<80x32xf32>
    %103 = vector.broadcast %100 : vector<1x32xf32> to vector<80x32xf32>
    %104 = arith.addf %102, %103 : vector<80x32xf32>
    %cst_31 = arith.constant 0.000000e+00 : f32
    %105 = vector.broadcast %cst_31 : f32 to vector<80x32xf32>
    %106 = arith.maximumf %104, %105 : vector<80x32xf32>
    %107 = arith.truncf %106 : vector<80x32xf32> to vector<80x32xbf16>
    %c4 = arith.constant 4 : index
    %c0_32 = arith.constant 0 : index
    %108 = vector.load %arg6[%c4, %c0_32] : memref<8x256xf32, #tpu.memory_space<vmem>>, vector<1x64xf32>
    %c5 = arith.constant 5 : index
    %c0_33 = arith.constant 0 : index
    %109 = vector.load %arg6[%c5, %c0_33] : memref<8x256xf32, #tpu.memory_space<vmem>>, vector<1x64xf32>
    %c0_34 = arith.constant 0 : index
    %c0_35 = arith.constant 0 : index
    %110 = vector.load %arg3[%c0_34, %c0_35] : memref<32x192xbf16, #tpu.memory_space<vmem>>, vector<32x192xbf16>
    %cst_36 = arith.constant dense<0.000000e+00> : vector<80x192xf32>
    %111 = tpu.matmul %107, %110, %cst_36 {dimension_numbers = #tpu.dot_dimension_numbers<[1], [0], [0], [1], [0, 0, 1, 1], [], []>} : vector<80x32xbf16>, vector<32x192xbf16>, vector<80x192xf32> -> vector<80x192xf32>
    %112 = vector.extract_strided_slice %111 {offsets = [0, 0], sizes = [80, 64], strides = [1, 1]} : vector<80x192xf32> to vector<80x64xf32>
    %113 = vector.extract_strided_slice %111 {offsets = [0, 64], sizes = [80, 64], strides = [1, 1]} : vector<80x192xf32> to vector<80x64xf32>
    %114 = vector.extract_strided_slice %111 {offsets = [0, 128], sizes = [80, 64], strides = [1, 1]} : vector<80x192xf32> to vector<80x64xf32>
    %c1_i32_37 = arith.constant 1 : i32
    %115 = tpu.dynamic_rotate %112 by %c1_i32_37 dim 0 : vector<80x64xf32>, i32 -> vector<80x64xf32>
    %116 = vector.broadcast %20 : vector<80x1xf32> to vector<80x64xf32>
    %117 = arith.mulf %116, %115 : vector<80x64xf32>
    %118 = arith.addf %113, %117 : vector<80x64xf32>
    %c79_i32_38 = arith.constant 79 : i32
    %119 = tpu.dynamic_rotate %114 by %c79_i32_38 dim 0 : vector<80x64xf32>, i32 -> vector<80x64xf32>
    %120 = vector.broadcast %24 : vector<80x1xf32> to vector<80x64xf32>
    %121 = arith.mulf %120, %119 : vector<80x64xf32>
    %122 = arith.addf %118, %121 : vector<80x64xf32>
    %cst_39 = arith.constant dense<0.000000e+00> : vector<64xf32>
    %123 = vector.multi_reduction <add>, %122, %cst_39 [0] : vector<80x64xf32> to vector<64xf32>
    %124 = vector.shape_cast %123 : vector<64xf32> to vector<1x64xf32>
    %cst_40 = arith.constant 1.250000e-02 : f32
    %125 = vector.broadcast %cst_40 : f32 to vector<1x64xf32>
    %126 = arith.mulf %124, %125 : vector<1x64xf32>
    %127 = arith.mulf %122, %122 : vector<80x64xf32>
    %cst_41 = arith.constant dense<0.000000e+00> : vector<64xf32>
    %128 = vector.multi_reduction <add>, %127, %cst_41 [0] : vector<80x64xf32> to vector<64xf32>
    %129 = vector.shape_cast %128 : vector<64xf32> to vector<1x64xf32>
    %cst_42 = arith.constant 1.250000e-02 : f32
    %130 = vector.broadcast %cst_42 : f32 to vector<1x64xf32>
    %131 = arith.mulf %129, %130 : vector<1x64xf32>
    %132 = arith.mulf %126, %126 : vector<1x64xf32>
    %133 = arith.subf %131, %132 : vector<1x64xf32>
    %cst_43 = arith.constant 0.000000e+00 : f32
    %134 = vector.broadcast %cst_43 : f32 to vector<1x64xf32>
    %135 = arith.maximumf %133, %134 : vector<1x64xf32>
    %cst_44 = arith.constant 9.99999974E-6 : f32
    %136 = vector.broadcast %cst_44 : f32 to vector<1x64xf32>
    %137 = arith.addf %135, %136 : vector<1x64xf32>
    %138 = math.rsqrt %137 : vector<1x64xf32>
    %139 = arith.mulf %108, %138 : vector<1x64xf32>
    %140 = arith.mulf %126, %139 : vector<1x64xf32>
    %141 = arith.subf %109, %140 : vector<1x64xf32>
    %142 = vector.broadcast %139 : vector<1x64xf32> to vector<80x64xf32>
    %143 = arith.mulf %122, %142 : vector<80x64xf32>
    %144 = vector.broadcast %141 : vector<1x64xf32> to vector<80x64xf32>
    %145 = arith.addf %143, %144 : vector<80x64xf32>
    %cst_45 = arith.constant 0.000000e+00 : f32
    %146 = vector.broadcast %cst_45 : f32 to vector<80x64xf32>
    %147 = arith.maximumf %145, %146 : vector<80x64xf32>
    %148 = vector.shape_cast %147 : vector<80x64xf32> to vector<10x8x64xf32>
    %c0_46 = arith.constant 0 : index
    %c0_47 = arith.constant 0 : index
    %c0_48 = arith.constant 0 : index
    %149 = vector.load %arg8[%c0_46, %c0_47, %c0_48] : memref<10x8x64xf32, #tpu.memory_space<vmem>>, vector<10x8x64xf32>
    tpu.vector_store %arg8[%c0_46, %c0_47, %c0_48], %148 {strides = array<i32>} : memref<10x8x64xf32, #tpu.memory_space<vmem>>, vector<10x8x64xf32>,
    %c0_49 = arith.constant 0 : index
    %c0_50 = arith.constant 0 : index
    %c0_51 = arith.constant 0 : index
    %150 = vector.load %arg8[%c0_49, %c0_50, %c0_51] : memref<10x8x64xf32, #tpu.memory_space<vmem>>, vector<10x1x64xf32>
    %151 = vector.shape_cast %150 : vector<10x1x64xf32> to vector<10x64xf32>
    %c0_52 = arith.constant 0 : index
    %c1_53 = arith.constant 1 : index
    %c0_54 = arith.constant 0 : index
    %152 = vector.load %arg8[%c0_52, %c1_53, %c0_54] : memref<10x8x64xf32, #tpu.memory_space<vmem>>, vector<10x1x64xf32>
    %153 = vector.shape_cast %152 : vector<10x1x64xf32> to vector<10x64xf32>
    %c0_55 = arith.constant 0 : index
    %c2_56 = arith.constant 2 : index
    %c0_57 = arith.constant 0 : index
    %154 = vector.load %arg8[%c0_55, %c2_56, %c0_57] : memref<10x8x64xf32, #tpu.memory_space<vmem>>, vector<10x1x64xf32>
    %155 = vector.shape_cast %154 : vector<10x1x64xf32> to vector<10x64xf32>
    %c0_58 = arith.constant 0 : index
    %c3_59 = arith.constant 3 : index
    %c0_60 = arith.constant 0 : index
    %156 = vector.load %arg8[%c0_58, %c3_59, %c0_60] : memref<10x8x64xf32, #tpu.memory_space<vmem>>, vector<10x1x64xf32>
    %157 = vector.shape_cast %156 : vector<10x1x64xf32> to vector<10x64xf32>
    %c0_61 = arith.constant 0 : index
    %c4_62 = arith.constant 4 : index
    %c0_63 = arith.constant 0 : index
    %158 = vector.load %arg8[%c0_61, %c4_62, %c0_63] : memref<10x8x64xf32, #tpu.memory_space<vmem>>, vector<10x1x64xf32>
    %159 = vector.shape_cast %158 : vector<10x1x64xf32> to vector<10x64xf32>
    %c0_64 = arith.constant 0 : index
    %c5_65 = arith.constant 5 : index
    %c0_66 = arith.constant 0 : index
    %160 = vector.load %arg8[%c0_64, %c5_65, %c0_66] : memref<10x8x64xf32, #tpu.memory_space<vmem>>, vector<10x1x64xf32>
    %161 = vector.shape_cast %160 : vector<10x1x64xf32> to vector<10x64xf32>
    %c0_67 = arith.constant 0 : index
    %c6 = arith.constant 6 : index
    %c0_68 = arith.constant 0 : index
    %162 = vector.load %arg8[%c0_67, %c6, %c0_68] : memref<10x8x64xf32, #tpu.memory_space<vmem>>, vector<10x1x64xf32>
    %163 = vector.shape_cast %162 : vector<10x1x64xf32> to vector<10x64xf32>
    %c0_69 = arith.constant 0 : index
    %c7 = arith.constant 7 : index
    %c0_70 = arith.constant 0 : index
    %164 = vector.load %arg8[%c0_69, %c7, %c0_70] : memref<10x8x64xf32, #tpu.memory_space<vmem>>, vector<10x1x64xf32>
    %165 = vector.shape_cast %164 : vector<10x1x64xf32> to vector<10x64xf32>
    %166 = tpu.concatenate %151, %153, %155, %157, %159, %161, %163, %165 in 1 : vector<10x64xf32>, vector<10x64xf32>, vector<10x64xf32>, vector<10x64xf32>, vector<10x64xf32>, vector<10x64xf32>, vector<10x64xf32>, vector<10x64xf32> -> vector<10x512xf32>
    %167 = arith.truncf %166 : vector<10x512xf32> to vector<10x512xbf16>
    %c0_71 = arith.constant 0 : index
    %c0_72 = arith.constant 0 : index
    %168 = vector.load %arg4[%c0_71, %c0_72] : memref<512x256xbf16, #tpu.memory_space<vmem>>, vector<512x256xbf16>
    %cst_73 = arith.constant dense<0.000000e+00> : vector<10x256xf32>
    %169 = tpu.matmul %167, %168, %cst_73 {dimension_numbers = #tpu.dot_dimension_numbers<[1], [0], [0], [1], [0, 0, 1, 1], [], []>} : vector<10x512xbf16>, vector<512x256xbf16>, vector<10x256xf32> -> vector<10x256xf32>
    %c6_74 = arith.constant 6 : index
    %c0_75 = arith.constant 0 : index
    %170 = vector.load %arg6[%c6_74, %c0_75] : memref<8x256xf32, #tpu.memory_space<vmem>>, vector<1x256xf32>
    %171 = vector.broadcast %170 : vector<1x256xf32> to vector<10x256xf32>
    %172 = arith.addf %169, %171 : vector<10x256xf32>
    %cst_76 = arith.constant 0.000000e+00 : f32
    %173 = vector.broadcast %cst_76 : f32 to vector<10x256xf32>
    %174 = arith.maximumf %172, %173 : vector<10x256xf32>
    %175 = arith.truncf %174 : vector<10x256xf32> to vector<10x256xbf16>
    %c0_77 = arith.constant 0 : index
    %c0_78 = arith.constant 0 : index
    %176 = vector.load %arg5[%c0_77, %c0_78] : memref<256x16xbf16, #tpu.memory_space<vmem>>, vector<256x16xbf16>
    %cst_79 = arith.constant dense<0.000000e+00> : vector<10x16xf32>
    %177 = tpu.matmul %175, %176, %cst_79 {dimension_numbers = #tpu.dot_dimension_numbers<[1], [0], [0], [1], [0, 0, 1, 1], [], []>} : vector<10x256xbf16>, vector<256x16xbf16>, vector<10x16xf32> -> vector<10x16xf32>
    %c7_80 = arith.constant 7 : index
    %c0_81 = arith.constant 0 : index
    %178 = vector.load %arg6[%c7_80, %c0_81] : memref<8x256xf32, #tpu.memory_space<vmem>>, vector<1x1xf32>
    %179 = vector.broadcast %178 : vector<1x1xf32> to vector<10x16xf32>
    %180 = arith.addf %177, %179 : vector<10x16xf32>
    %cst_82 = arith.constant 0.000000e+00 : f32
    %181 = vector.broadcast %cst_82 : f32 to vector<10x16xf32>
    %182 = arith.subf %181, %180 : vector<10x16xf32>
    %183 = math.exp %182 : vector<10x16xf32>
    %cst_83 = arith.constant 1.000000e+00 : f32
    %184 = vector.broadcast %cst_83 : f32 to vector<10x16xf32>
    %185 = arith.addf %184, %183 : vector<10x16xf32>
    %186 = tpu.reciprocal %185 {approx = true} : vector<10x16xf32> -> vector<10x16xf32>
    %c0_84 = arith.constant 0 : index
    %c0_85 = arith.constant 0 : index
    %187 = vector.load %arg7[%c0_84, %c0_85] : memref<10x16xf32, #tpu.memory_space<vmem>>, vector<10x16xf32>
    tpu.vector_store %arg7[%c0_84, %c0_85], %186 {strides = array<i32>} : memref<10x16xf32, #tpu.memory_space<vmem>>, vector<10x16xf32>,
    return
  }
}

</mosaic_0001>

<bundles_post_ra>
// kernel: _forward.1
= control target key start
LH: loop header
LB: loop body
LE: loop exit
PB: predicated region body
PF: predicated region fallthrough
CT: control target
= control target key end

     0   :  { %12 = vsyncpa [#allocation4], 0  ;;  %s3135_s24 = smov [#allocation3]   ;;  %s4300_s0 = inlined_call_operand.vmem [shape: bf16[80,128], index: 0, kind: input, shape index: {}]   ;;  %s4301_s1 = inlined_call_operand.vmem [shape: bf16[128,48], index: 1, kind: input, shape index: {}]   ;;  %s4302_s2 = inlined_call_operand.vmem [shape: bf16[16,96], index: 2, kind: input, shape index: {}]   ;;  %s4303_s3 = inlined_call_operand.vmem [shape: bf16[32,192], index: 3, kind: input, shape index: {}]   ;;  %s4304_s4 = inlined_call_operand.hbm [shape: bf16[512,256], index: 4, kind: input, shape index: {}]   ;;  %s4305_s5 = inlined_call_operand.vmem [shape: bf16[256,16], index: 5, kind: input, shape index: {}]   ;;  %s4306_s6 = inlined_call_operand.vmem [shape: f32[8,256], index: 6, kind: input, shape index: {}]   ;;  %s4307_s7 = inlined_call_operand.vmem [shape: f32[10,16], index: 7, kind: output, shape index: {}]  }
   0x1   :  { %s26_s25 = sshll.u32 %s3135_s24, 4  ;;  %s3111_s28 = scalar_lea.hbm %s4304_s4, 8192  ;;  %s27_s25 = int_to_ptr.vmem [resolvable:$true] %s26_s25 }
   0x2   :  { %p3112_p0 = scmp.ne.s32.totalorder %s4304_s4, %s3111_s28  ;;  %p3115_p1 = scmp.lt.u32.totalorder %s3111_s28, %s4304_s4 }
   0x4   :  { %p3117_p2 = pnand %p3115_p1, %p3112_p0 }
   0x6   :  { %3120 = shalt.err (!%p3117_p2)
}
   0x7   :  { %s3121_s10 = scalar_lea.vmem %s27_s25, 8192  ;;  %p3126_p4 = scmp.lt.s32.totalorder %s27_s25, %s27_s25 }
   0x8   :  { %p3122_p3 = scmp.ne.s32.totalorder %s27_s25, %s3121_s10  ;;  %p3127_p5 = scmp.lt.s32.totalorder %s3121_s10, %s3121_s10 }
   0xa   :  { %p3128_p6 = por %p3127_p5, %p3126_p4 }
   0xc   :  { %p3129_p7 = pnand %p3128_p6, %p3122_p3 }
   0xe   :  { %3132 = shalt.err (!%p3129_p7)
}
   0xf   :  { %s3136_s11 = smov 128   ;;  %s3137_s12 = smov 8  }
  0x10   :  { %32 = dma.hbm_to_vmem [thread:$0]  %s4304_s4, 8192, %s27_s25, [#allocation4], %s3136_s11, %s3136_s11, %s3137_s12  }
  0x11   :  { %3133 = dma.done.wait [#allocation4], 8192  }
  0x12   :  { %3134 = vsyncadd [#allocation4], 4294959104  ;;  %v3138_v0 = vmov 0.0   ;;  %vm3139_vm0 = vmmov 0   ;;  %v2965_v1 = vld [vmem:[%s4301_s1] sm:$0xff]   ;;  %v2966_v2 = vld [vmem:[%s4301_s1 + $0x8] sm:$0xff]   ;;  %v41_v14 = vlaneseq }
  0x13   :  { %2866 = vmatprep.subr.bf16.mxu0 %v3138_v0  ;;  %2882 = vmatprep.mubr.msk.bf16.mxu0 %vm3139_vm0, %v3138_v0  ;;  %v2967_v3 = vld [vmem:[%s4301_s1 + $0x10] sm:$0xff]   ;;  %v2968_v4 = vld [vmem:[%s4301_s1 + $0x18] sm:$0xff]   ;;  %v2969_v5 = vld [vmem:[%s4301_s1 + $0x20] sm:$0xff]   ;;  %s3140_s16 = smov 96   ;;  %s3142_s4 = smov 112  }
  0x14   :  { %2902 = vmatprep.subr.bf16.mxu1 %v3138_v0  ;;  %2904 = vmatprep.mubr.msk.bf16.mxu1 %vm3139_vm0, %v3138_v0  ;;  %v2970_v6 = vld [vmem:[%s4301_s1 + $0x28] sm:$0xff]   ;;  %v2971_v7 = vld [vmem:[%s4301_s1 + $0x30] sm:$0xff]   ;;  %v2972_v8 = vld [vmem:[%s4301_s1 + $0x38] sm:$0xff]   ;;  %v3260_v16 = vshrl.u32 %v41_v14, 7  ;;  %s3144_s23 = smov 32  }
  0x15   :  { %2867 = vmatpush3.bf16.msra.mxu0 %v2965_v1  ;;  %v2973_v9 = vld [vmem:[%s4300_s0] sm:$0xff]   ;;  %v2974_v10 = vld [vmem:[%s4300_s0 + $0x8] sm:$0xff]   ;;  %v2975_v11 = vld [vmem:[%s4300_s0 + $0x10] sm:$0xff]  }
  0x16   :  { %2868 = vmatprep.subr.bf16.mxu0 %v3138_v0  ;;  %v2976_v12 = vld [vmem:[%s4300_s0 + $0x18] sm:$0xff]   ;;  %v2977_v13 = vld [vmem:[%s4300_s0 + $0x20] sm:$0xff]   ;;  %vm421_vm1 = vcmp.lt.s32.totalorder %v3260_v16, 1  ;;  %v3302_v38 = vadd.s32 16, %v3260_v16  ;;  %v3307_v40 = vadd.s32 8, %v3260_v16  ;;  %v3318_v46 = vadd.s32 24, %v3260_v16 }
  0x17   :  { %v56_v51 = vand.u32 7, %v3260_v16  ;;  %v3335_v54 = vadd.s32 32, %v3260_v16  ;;  %v3354_v62 = vadd.s32 40, %v3260_v16  ;;  %s3141_s0 = smov 16   ;;  %vm542_vm10 = vcmp.lt.s32.totalorder %v3260_v16, 7 }
  0x18   :  { %v70_v44 = vand.u32 7, %v3302_v38  ;;  %v63_v49 = vand.u32 7, %v3307_v40  ;;  %v77_v53 = vand.u32 7, %v3318_v46 }
  0x19   :  { %2869 = vmatpush3.bf16.msra.mxu0 %v2966_v2  ;;  %vm172_vm4 = vcmp.gt.s32.totalorder %v56_v51, 0  ;;  %v84_v61 = vand.u32 7, %v3335_v54  ;;  %vm202_vm9 = vcmp.lt.s32.totalorder %v56_v51, 7 }
  0x1a   :  { %2870 = vmatprep.subr.bf16.mxu0 %v3138_v0  ;;  %vm174_vm2 = vcmp.gt.s32.totalorder %v70_v44, 0  ;;  %vm173_vm3 = vcmp.gt.s32.totalorder %v63_v49, 0  ;;  %vm175_vm5 = vcmp.gt.s32.totalorder %v77_v53, 0  ;;  %vm203_vm12 = vcmp.lt.s32.totalorder %v63_v49, 7 }
  0x1b   :  { %v3340_v56 = vsel %vm174_vm2, 1.0, %v3138_v0  ;;  %v3348_v60 = vsel %vm173_vm3, 1.0, %v3138_v0  ;;  %vm176_vm6 = vcmp.gt.s32.totalorder %v84_v61, 0  ;;  %vm204_vm14 = vcmp.lt.s32.totalorder %v70_v44, 7 }
  0x1c   :  { %vm205_vm15 = vcmp.lt.s32.totalorder %v77_v53, 7  ;;  %vm206_vm3 = vcmp.lt.s32.totalorder %v84_v61, 7 }
  0x1d   :  { %2871 = vmatpush3.bf16.msra.mxu0 %v2967_v3  ;;  %v3361_v3 = vsel %vm172_vm4, 1.0, %v3138_v0 }
  0x1e   :  { %2872 = vmatprep.subr.bf16.mxu0 %v3138_v0 }
  0x21   :  { %2873 = vmatpush3.bf16.msra.mxu0 %v2968_v4 }
  0x22   :  { %2874 = vmatprep.subr.bf16.mxu0 %v3138_v0 }
  0x25   :  { %2875 = vmatpush3.bf16.msra.mxu0 %v2969_v5 }
  0x26   :  { %2876 = vmatprep.subr.bf16.mxu0 %v3138_v0 }
  0x29   :  { %2877 = vmatpush3.bf16.msra.mxu0 %v2970_v6 }
  0x2a   :  { %2878 = vmatprep.subr.bf16.mxu0 %v3138_v0 }
  0x2d   :  { %2879 = vmatpush3.bf16.msra.mxu0 %v2971_v7 }
  0x2e   :  { %2880 = vmatprep.subr.bf16.mxu0 %v3138_v0 }
  0x31   :  { %2881 = vmatpush3.bf16.msra.mxu0 %v2972_v8 }
  0x34   :  { %2883 = vmatmul.mubr.bf16.vlgmr.msra.gmra.mrb[0].mxu0 %v2973_v9  ;;  %v3379_v9 = vsel %vm175_vm5, 1.0, %v3138_v0 }
  0x35   :  { %2886 = vmatprep.mubr.msk.bf16.mxu0 %vm3139_vm0, %v3138_v0 }
  0x3c   :  { %2887 = vmatmul.mubr.bf16.gmra.mrb[4].mxu0 %v2974_v10  ;;  %v91_v10 = vand.u32 7, %v3354_v62 }
  0x3d   :  { %2890 = vmatprep.mubr.msk.bf16.mxu0 %vm3139_vm0, %v3138_v0 }
  0x3e   :  { %vm177_vm7 = vcmp.gt.s32.totalorder %v91_v10, 0  ;;  %vm207_vm4 = vcmp.lt.s32.totalorder %v91_v10, 7 }
  0x44   :  { %2891 = vmatmul.mubr.bf16.gmra.mrb[8].mxu0 %v2975_v11  ;;  %v3386_v11 = vadd.s32 48, %v3260_v16 }
  0x45   :  { %2894 = vmatprep.mubr.msk.bf16.mxu0 %vm3139_vm0, %v3138_v0 }
  0x46   :  { %v98_v14 = vand.u32 7, %v3386_v11 }
  0x48   :  { %vm178_vm8 = vcmp.gt.s32.totalorder %v98_v14, 0  ;;  %vm208_vm5 = vcmp.lt.s32.totalorder %v98_v14, 7 }
  0x49   :  { %v3500_v10 = vsel %vm208_vm5, 1.0, %v3138_v0  ;;  %vm1784_vm5 = vcmask 1047559  }
  0x4c   :  { %2895 = vmatmul.mubr.bf16.gmra.mrb[12].mxu0 %v2976_v12 }
  0x4d   :  { %2898 = vmatprep.mubr.msk.bf16.mxu0 %vm3139_vm0, %v3138_v0 }
  0x54   :  { %2899 = vmatmul.mubr.bf16.gmra.mrb[16].mxu0 %v2977_v13  ;;  %v3391_v13 = vsel %vm176_vm6, 1.0, %v3138_v0 }
 0x107   :  { %v3258_v15 = vpop.f32.mrb[0].mxu0 }
 0x108   :  { %502 = vrot.lane.b32.xlu0 %v3258_v15, %s3140_s16  ;;  %v2884_v17 = vpop.f32.mrb[1].mxu0  ;;  %v411_v19 = vrot.slane %v3258_v15, 7 }
 0x109   :  { %v3264_v18 = vpop.f32.mrb[2].mxu0 }
 0x10a   :  { %v412_v20 = vrot.slane %v3264_v18, 7  ;;  %v2885_v21 = vpop.f32.mrb[3].mxu0 }
 0x10b   :  { %v3406_v21 = vsel %vm178_vm8, 1.0, %v3138_v0 }
 0x10c   :  { %504 = vrot.lane.b32.xlu0 %v3264_v18, %s3140_s16  ;;  %v430_v22 = vsel %vm421_vm1, %v411_v19, %v412_v20 }
 0x10d   :  { %v433_v5 = vmul.f32 %v3348_v60, %v430_v22 }
 0x10f   :  { %v3275_v23 = vpop.f32.mrb[4].mxu0 }
 0x110   :  { %v413_v24 = vrot.slane %v3275_v23, 7  ;;  %506 = vrot.lane.b32.xlu1 %v3275_v23, %s3140_s16  ;;  %v2888_v25 = vpop.f32.mrb[5].mxu0 }
 0x111   :  { %v3280_v26 = vpop.f32.mrb[6].mxu0 }
 0x112   :  { %v414_v27 = vrot.slane %v3280_v26, 7  ;;  %v2889_v28 = vpop.f32.mrb[7].mxu0  ;;  %v429_v29 = vsel %vm421_vm1, %v412_v20, %v413_v24 }
 0x113   :  { %v434_v2 = vmul.f32 %v3340_v56, %v429_v29  ;;  %v3418_v28 = vadd.s32 64, %v3260_v16 }
 0x114   :  { %508 = vrot.lane.b32.xlu1 %v3280_v26, %s3140_s16  ;;  %v428_v30 = vsel %vm421_vm1, %v413_v24, %v414_v27  ;;  %v3412_v24 = vadd.s32 56, %v3260_v16 }
 0x115   :  { %v435_v12 = vmul.f32 %v3379_v9, %v428_v30 }
 0x117   :  { %v3289_v31 = vpop.f32.mrb[8].mxu0 }
 0x118   :  { %v415_v32 = vrot.slane %v3289_v31, 7  ;;  %510 = vrot.lane.b32.xlu0 %v3289_v31, %s3140_s16  ;;  %v2892_v33 = vpop.f32.mrb[9].mxu0 }
 0x119   :  { %v3294_v34 = vpop.f32.mrb[10].mxu0  ;;  %v3423_v33 = vsel %vm202_vm9, 1.0, %v3138_v0  ;;  %vm613_vm9 = vcmask 261248  }
 0x11a   :  { %v416_v35 = vrot.slane %v3294_v34, 7  ;;  %512 = vrot.lane.b32.xlu1 %v3294_v34, %s3140_s16  ;;  %v2893_v36 = vpop.f32.mrb[11].mxu0  ;;  %v427_v37 = vsel %vm421_vm1, %v414_v27, %v415_v32  ;;  %v105_v27 = vand.u32 7, %v3412_v24 }
 0x11b   :  { %v436_v17 = vmul.f32 %v3391_v13, %v427_v37  ;;  %v51_v36 = vadd.s32 72, %v3260_v16 }
 0x11c   :  { %v426_v39 = vsel %vm421_vm1, %v415_v32, %v416_v35  ;;  %vm179_vm11 = vcmp.gt.s32.totalorder %v105_v27, 0  ;;  %vm209_vm6 = vcmp.lt.s32.totalorder %v105_v27, 7 }
 0x11f   :  { %v3309_v41 = vpop.f32.mrb[12].mxu0 }
 0x120   :  { %v417_v42 = vrot.slane %v3309_v41, 7  ;;  %514 = vrot.lane.b32.xlu0 %v3309_v41, %s3140_s16  ;;  %v2896_v43 = vpop.f32.mrb[13].mxu0 }
 0x121   :  { %v3315_v45 = vpop.f32.mrb[14].mxu0  ;;  %v3435_v43 = vsel %vm179_vm11, 1.0, %v3138_v0  ;;  %vm772_vm11 = vcmask 130048  }
 0x122   :  { %v418_v47 = vrot.slane %v3315_v45, 7  ;;  %516 = vrot.lane.b32.xlu1 %v3315_v45, %s3140_s16  ;;  %v2897_v48 = vpop.f32.mrb[15].mxu0  ;;  %v425_v50 = vsel %vm421_vm1, %v416_v35, %v417_v42  ;;  %v112_v35 = vand.u32 7, %v3418_v28 }
 0x123   :  { %v438_v22 = vmul.f32 %v3406_v21, %v425_v50  ;;  %v119_v48 = vand.u32 7, %v51_v36 }
 0x124   :  { %v3331_v52 = vsel %vm421_vm1, %v417_v42, %v418_v47  ;;  %vm180_vm13 = vcmp.gt.s32.totalorder %v112_v35, 0  ;;  %vm210_vm8 = vcmp.lt.s32.totalorder %v112_v35, 7 }
 0x125   :  { %v439_v51 = vmul.f32 %v3435_v43, %v3331_v52  ;;  %vm181_vm2 = vcmp.gt.s32.totalorder %v119_v48, 0 }
 0x127   :  { %v3337_v55 = vpop.f32.mrb[16].mxu0 }
 0x128   :  { %v419_v57 = vrot.slane %v3337_v55, 7  ;;  %518 = vrot.lane.b32.xlu0 %v3337_v55, %s3140_s16  ;;  %v2900_v58 = vpop.f32.mrb[17].mxu0 }
 0x129   :  { %v3345_v59 = vpop.f32.mrb[18].mxu0 }
 0x12a   :  { %v420_v63 = vrot.slane %v3345_v59, 7  ;;  %520 = vrot.lane.b32.xlu1 %v3345_v59, %s3140_s16  ;;  %v2901_v1 = vpop.f32.mrb[19].mxu0  ;;  %v3365_v4 = vsel %vm421_vm1, %v418_v47, %v419_v57  ;;  %v3438_v47 = vsel %vm203_vm12, 1.0, %v3138_v0  ;;  %vm1236_vm12 = vcmask 261120  }
 0x12b   :  { %v3454_v1 = vsel %vm204_vm14, 1.0, %v3138_v0  ;;  %vm1769_vm14 = vcmask 1042434  }
 0x12c   :  { %456 = vrot.lane.b32.xlu0 %v434_v2, %s3141_s0  ;;  %v431_v6 = vsel %vm421_vm1, %v420_v63, %v411_v19  ;;  %v3375_v7 = vsel %vm421_vm1, %v419_v57, %v420_v63  ;;  %v3399_v19 = vsel %vm177_vm7, 1.0, %v3138_v0  ;;  %v3451_v63 = vsel %vm180_vm13, 1.0, %v3138_v0 }
 0x12d   :  { %v432_v8 = vmul.f32 %v3361_v3, %v431_v6  ;;  %v437_v20 = vmul.f32 %v3399_v19, %v426_v39  ;;  %v440_v52 = vmul.f32 %v3451_v63, %v3365_v4  ;;  %v3466_v6 = vsel %vm205_vm15, 1.0, %v3138_v0 }
 0x12e   :  { %454 = vrot.lane.b32.xlu1 %v433_v5, %s3141_s0  ;;  %vm211_vm7 = vcmp.lt.s32.totalorder %v119_v48, 7  ;;  %vm1766_vm13 = vcmask 1041409   ;;  %vm1772_vm15 = vcmask 1043459  }
 0x12f   :  { %v3517_v24 = vsel %vm211_vm7, 1.0, %v3138_v0 }
 0x130   :  { %452 = vrot.lane.b32.xlu0 %v432_v8, %s3141_s0  ;;  %v3469_v8 = vsel %vm181_vm2, 1.0, %v3138_v0  ;;  %vm1775_vm2 = vcmask 1044484  }
 0x132   :  { %458 = vrot.lane.b32.xlu1 %v435_v12, %s3141_s0 }
 0x136   :  { %460 = vrot.lane.b32.xlu1 %v436_v17, %s3141_s0  ;;  %v441_v17 = vmul.f32 %v3469_v8, %v3375_v7 }
 0x13a   :  { %462 = vrot.lane.b32.xlu1 %v437_v20, %s3141_s0  ;;  %v3481_v20 = vsel %vm206_vm3, 1.0, %v3138_v0  ;;  %vm1778_vm3 = vcmask 1045509  }
 0x13e   :  { %464 = vrot.lane.b32.xlu1 %v438_v22, %s3141_s0 }
 0x17a   :  { %v3414_v25 = vpop.permute.xlu0 %502 }
 0x17b   :  { %v532_v30 = vrot.slane %v3414_v25, 1 }
 0x17e   :  { %v505_v29 = vpop.permute.xlu0 %504 }
 0x17f   :  { %v533_v32 = vrot.slane %v505_v29, 1 }
 0x181   :  { %v551_v37 = vsel %vm542_vm10, %v532_v30, %v533_v32 }
 0x182   :  { %v507_v39 = vpop.permute.xlu1 %506  ;;  %v553_v40 = vmul.f32 %v3423_v33, %v551_v37 }
 0x183   :  { %v534_v42 = vrot.slane %v507_v39, 1 }
 0x184   :  { %573 = vrot.lane.b32.xlu1 %v553_v40, %s3141_s0 }
 0x185   :  { %v550_v49 = vsel %vm542_vm10, %v533_v32, %v534_v42  ;;  %v3491_v32 = vsel %vm207_vm4, 1.0, %v3138_v0  ;;  %vm1781_vm4 = vcmask 1046534  }
 0x186   :  { %v509_v50 = vpop.permute.xlu1 %508  ;;  %v554_v57 = vmul.f32 %v3438_v47, %v550_v49 }
 0x187   :  { %v535_v58 = vrot.slane %v509_v50, 1 }
 0x188   :  { %466 = vrot.lane.b32.xlu1 %v439_v51, %s3141_s0  ;;  %575 = vrot.lane.b32.xlu0 %v554_v57, %s3141_s0  ;;  %v3525_v57 = vsel %vm210_vm8, 1.0, %v3138_v0 }
 0x189   :  { %v549_v38 = vsel %vm542_vm10, %v534_v42, %v535_v58  ;;  %v3509_v42 = vsel %vm209_vm6, 1.0, %v3138_v0  ;;  %vm2689_vm6 = vcmask 123904  }
 0x18a   :  { %v511_v44 = vpop.permute.xlu0 %510  ;;  %v555_v2 = vmul.f32 %v3454_v1, %v549_v38 }
 0x18b   :  { %v536_v5 = vrot.slane %v511_v44, 1 }
 0x18c   :  { %v513_v12 = vpop.permute.xlu1 %512  ;;  %468 = vrot.lane.b32.xlu1 %v440_v52, %s3141_s0  ;;  %577 = vrot.lane.b32.xlu0 %v555_v2, %s3141_s0 }
 0x18d   :  { %v537_v46 = vrot.slane %v513_v12, 1  ;;  %v548_v53 = vsel %vm542_vm10, %v535_v58, %v536_v5 }
 0x18e   :  { %v556_v4 = vmul.f32 %v3466_v6, %v548_v53 }
 0x18f   :  { %v547_v22 = vsel %vm542_vm10, %v536_v5, %v537_v46 }
 0x190   :  { %579 = vrot.lane.b32.xlu0 %v556_v4, %s3141_s0  ;;  %470 = vrot.lane.b32.xlu1 %v441_v17, %s3141_s0  ;;  %v557_v61 = vmul.f32 %v3481_v20, %v547_v22 }
 0x192   :  { %v515_v54 = vpop.permute.xlu0 %514 }
 0x193   :  { %v538_v29 = vrot.slane %v515_v54, 1 }
 0x194   :  { %v517_v7 = vpop.permute.xlu1 %516  ;;  %581 = vrot.lane.b32.xlu0 %v557_v61, %s3141_s0 }
 0x195   :  { %v539_v36 = vrot.slane %v517_v7, 1  ;;  %v546_v37 = vsel %vm542_vm10, %v537_v46, %v538_v29 }
 0x196   :  { %v558_v62 = vmul.f32 %v3491_v32, %v546_v37 }
 0x197   :  { %v545_v39 = vsel %vm542_vm10, %v538_v29, %v539_v36 }
 0x198   :  { %583 = vrot.lane.b32.xlu0 %v558_v62, %s3141_s0  ;;  %v559_v11 = vmul.f32 %v3500_v10, %v545_v39 }
 0x19a   :  { %v519_v40 = vpop.permute.xlu0 %518 }
 0x19b   :  { %v540_v14 = vrot.slane %v519_v40, 1 }
 0x19c   :  { %v521_v49 = vpop.permute.xlu1 %520  ;;  %585 = vrot.lane.b32.xlu0 %v559_v11, %s3141_s0 }
 0x19d   :  { %v541_v50 = vrot.slane %v521_v49, 1  ;;  %v544_v51 = vsel %vm542_vm10, %v539_v36, %v540_v14 }
 0x19e   :  { %v560_v27 = vmul.f32 %v3509_v42, %v544_v51 }
 0x19f   :  { %v552_v48 = vsel %vm542_vm10, %v541_v50, %v532_v30  ;;  %v543_v28 = vsel %vm542_vm10, %v540_v14, %v541_v50  ;;  %v457_v30 = vpop.permute.xlu0 %456 }
 0x1a0   :  { %587 = vrot.lane.b32.xlu0 %v560_v27, %s3141_s0  ;;  %v562_v35 = vmul.f32 %v3517_v24, %v552_v48  ;;  %v561_v58 = vmul.f32 %v3525_v57, %v543_v28  ;;  %v455_v25 = vpop.permute.xlu1 %454  ;;  %v484_v22 = vadd.f32 %v457_v30, %v3275_v23 }
 0x1a1   :  { %v483_v4 = vadd.f32 %v455_v25, %v3264_v18 }
 0x1a2   :  { %591 = vrot.lane.b32.xlu1 %v562_v35, %s3141_s0 }
 0x1a3   :  { %v453_v2 = vpop.permute.xlu0 %452 }
 0x1a4   :  { %589 = vrot.lane.b32.xlu0 %v561_v58, %s3141_s0  ;;  %v459_v38 = vpop.permute.xlu1 %458  ;;  %v482_v54 = vadd.f32 %v453_v2, %v3258_v15 }
 0x1a5   :  { %v485_v7 = vadd.f32 %v459_v38, %v3280_v26 }
 0x1a8   :  { %v461_v44 = vpop.permute.xlu1 %460 }
 0x1a9   :  { %v486_v39 = vadd.f32 %v461_v44, %v3289_v31 }
 0x1ac   :  { %v463_v52 = vpop.permute.xlu1 %462 }
 0x1ad   :  { %v487_v15 = vadd.f32 %v463_v52, %v3294_v34 }
 0x1b0   :  { %v465_v5 = vpop.permute.xlu1 %464 }
 0x1b1   :  { %v488_v28 = vadd.f32 %v465_v5, %v3309_v41 }
 0x1f6   :  { %v574_v46 = vpop.permute.xlu1 %573 }
 0x1f7   :  { %v3540_v36 = vadd.f32 %v574_v46, %v482_v54 }
 0x1f9   :  { %v640_v23 = vmul.f32 %v3540_v36, %v3540_v36  ;;  %v614_v31 = vsel %vm613_vm9, %v3540_v36, 0.0 }
 0x1fa   :  { %v576_v12 = vpop.permute.xlu0 %575  ;;  %v467_v29 = vpop.permute.xlu1 %466 }
 0x1fb   :  { %v3537_v61 = vadd.f32 %v576_v12, %v483_v4  ;;  %v650_v58 = vsel %vm613_vm9, %v640_v23, 0.0 }
 0x1fd   :  { %v641_v18 = vmul.f32 %v3537_v61, %v3537_v61  ;;  %v615_v26 = vsel %vm613_vm9, %v3537_v61, 0.0 }
 0x1fe   :  { %v578_v53 = vpop.permute.xlu0 %577  ;;  %v469_v49 = vpop.permute.xlu1 %468  ;;  %v616_v35 = vadd.f32 %v615_v26, %v614_v31 }
 0x1ff   :  { %v3542_v37 = vadd.f32 %v578_v53, %v484_v22  ;;  %v651_v51 = vsel %vm613_vm9, %v641_v18, 0.0  ;;  %v489_v22 = vadd.f32 %v467_v29, %v3315_v45  ;;  %v490_v45 = vadd.f32 %v469_v49, %v3337_v55 }
 0x200   :  { %v652_v30 = vadd.f32 %v651_v51, %v650_v58 }
 0x201   :  { %v642_v11 = vmul.f32 %v3542_v37, %v3542_v37  ;;  %v617_v34 = vsel %vm613_vm9, %v3542_v37, 0.0 }
 0x202   :  { %v580_v17 = vpop.permute.xlu0 %579  ;;  %v618_v52 = vadd.f32 %v617_v34, %v616_v35 }
 0x203   :  { %v3547_v40 = vadd.f32 %v580_v17, %v485_v7  ;;  %v653_v25 = vsel %vm613_vm9, %v642_v11, 0.0  ;;  %v471_v17 = vpop.permute.xlu1 %470 }
 0x204   :  { %v654_v53 = vadd.f32 %v653_v25, %v652_v30  ;;  %v491_v23 = vadd.f32 %v471_v17, %v3345_v59 }
 0x205   :  { %v643_v27 = vmul.f32 %v3547_v40, %v3547_v40  ;;  %v619_v38 = vsel %vm613_vm9, %v3547_v40, 0.0 }
 0x206   :  { %v582_v62 = vpop.permute.xlu0 %581  ;;  %v620_v4 = vadd.f32 %v619_v38, %v618_v52 }
 0x207   :  { %v3556_v14 = vadd.f32 %v582_v62, %v486_v39  ;;  %v655_v12 = vsel %vm613_vm9, %v643_v27, 0.0 }
 0x208   :  { %v656_v39 = vadd.f32 %v655_v12, %v654_v53 }
 0x209   :  { %v644_v44 = vmul.f32 %v3556_v14, %v3556_v14  ;;  %v621_v46 = vsel %vm613_vm9, %v3556_v14, 0.0 }
 0x20a   :  { %v584_v50 = vpop.permute.xlu0 %583  ;;  %v622_v18 = vadd.f32 %v621_v46, %v620_v4 }
 0x20b   :  { %v3565_v48 = vadd.f32 %v584_v50, %v487_v15  ;;  %v657_v54 = vsel %vm613_vm9, %v644_v44, 0.0 }
 0x20c   :  { %v658_v29 = vadd.f32 %v657_v54, %v656_v39 }
 0x20d   :  { %v645_v41 = vmul.f32 %v3565_v48, %v3565_v48  ;;  %v623_v7 = vsel %vm613_vm9, %v3565_v48, 0.0 }
 0x20e   :  { %v586_v2 = vpop.permute.xlu0 %585  ;;  %v624_v50 = vadd.f32 %v623_v7, %v622_v18 }
 0x20f   :  { %v3579_v5 = vadd.f32 %v586_v2, %v488_v28  ;;  %v659_v26 = vsel %vm613_vm9, %v645_v41, 0.0 }
 0x210   :  { %v660_v35 = vadd.f32 %v659_v26, %v658_v29 }
 0x211   :  { %v646_v62 = vmul.f32 %v3579_v5, %v3579_v5  ;;  %v625_v11 = vsel %vm613_vm9, %v3579_v5, 0.0 }
 0x212   :  { %v588_v15 = vpop.permute.xlu0 %587  ;;  %v626_v58 = vadd.f32 %v625_v11, %v624_v50 }
 0x213   :  { %v3591_v31 = vadd.f32 %v588_v15, %v489_v22  ;;  %v661_v34 = vsel %vm613_vm9, %v646_v62, 0.0 }
 0x214   :  { %v592_v51 = vpop.permute.xlu1 %591  ;;  %v662_v55 = vadd.f32 %v661_v34, %v660_v35 }
 0x215   :  { %v627_v27 = vsel %vm613_vm9, %v3591_v31, 0.0  ;;  %v647_v59 = vmul.f32 %v3591_v31, %v3591_v31  ;;  %v3599_v28 = vadd.f32 %v592_v51, %v491_v23 }
 0x216   :  { %v590_v25 = vpop.permute.xlu0 %589  ;;  %v628_v49 = vadd.f32 %v627_v27, %v626_v58 }
 0x217   :  { %v663_v38 = vsel %vm613_vm9, %v647_v59, 0.0  ;;  %v3602_v44 = vadd.f32 %v590_v25, %v490_v45  ;;  %v649_v30 = vmul.f32 %v3599_v28, %v3599_v28  ;;  %v631_v41 = vsel %vm613_vm9, %v3599_v28, 0.0 }
 0x218   :  { %v664_v12 = vadd.f32 %v663_v38, %v662_v55  ;;  %v242_v55 = vld [vmem:[%s4306_s6] ss:$0 sm:$0xff] }
 0x219   :  { %v629_v52 = vsel %vm613_vm9, %v3602_v44, 0.0  ;;  %v648_v2 = vmul.f32 %v3602_v44, %v3602_v44  ;;  %v667_v22 = vsel %vm613_vm9, %v649_v30, 0.0  ;;  %v3619_v30 = vsub.s32 0, %v3260_v16 }
 0x21a   :  { %v630_v46 = vadd.f32 %v629_v52, %v628_v49 }
 0x21b   :  { %v665_v53 = vsel %vm613_vm9, %v648_v2, 0.0 }
 0x21c   :  { %v632_v4 = vadd.f32 %v631_v41, %v630_v46  ;;  %v666_v17 = vadd.f32 %v665_v53, %v664_v12  ;;  %v243_v41 = vld [vmem:[%s4306_s6 + $0x1] ss:$0 sm:$0xff] }
 0x21e   :  { %v633_v54 = vrot.slane %v632_v4, 4  ;;  %v668_v7 = vadd.f32 %v667_v22, %v666_v17  ;;  %v2978_v22 = vld [vmem:[%s4302_s2] sm:$0xff]   ;;  %s3143_s2 = smov 64  }
 0x21f   :  { %2903 = vmatpush3.bf16.msra.mxu1 %v2978_v22 }
 0x220   :  { %v634_v62 = vadd.f32 %v633_v54, %v632_v4  ;;  %v669_v39 = vrot.slane %v668_v7, 4 }
 0x222   :  { %v635_v18 = vrot.slane %v634_v62, 2  ;;  %v670_v15 = vadd.f32 %v669_v39, %v668_v7 }
 0x224   :  { %v636_v23 = vadd.f32 %v635_v18, %v634_v62  ;;  %v671_v26 = vrot.slane %v670_v15, 2 }
 0x226   :  { %v637_v11 = vrot.slane %v636_v23, 1  ;;  %v672_v45 = vadd.f32 %v671_v26, %v670_v15 }
 0x228   :  { %v638_v29 = vadd.f32 %v637_v11, %v636_v23  ;;  %v673_v50 = vrot.slane %v672_v45, 1 }
 0x22a   :  { %v639_v51 = vmul.f32 0.0125, %v638_v29  ;;  %v674_v34 = vadd.f32 %v673_v50, %v672_v45 }
 0x22c   :  { %v675_v27 = vmul.f32 0.0125, %v674_v34  ;;  %v676_v59 = vmul.f32 %v639_v51, %v639_v51 }
 0x22e   :  { %v677_v35 = vsub.f32 %v675_v27, %v676_v59 }
 0x230   :  { %v678_v58 = vmax.f32 %v677_v35, 0.0 }
 0x232   :  { %v679_v25 = vadd.f32 1e-05, %v678_v58 }
 0x234   :  { %3097 = vrsqrt.f32 %v679_v25 }
 0x23e   :  { %v3098_v38 = vpop.eup %3097 }
 0x23f   :  { %682 = vrot.lane.b32.xlu0 %v3098_v38, %s3142_s4 }
 0x2b1   :  { %v683_v49 = vpop.permute.xlu0 %682 }
 0x2b2   :  { %v685_v52 = vmul.f32 %v683_v49, %v242_v55 }
 0x2b4   :  { %687 = vrot.lane.b32.xlu1 %v685_v52, %s3141_s0  ;;  %v699_v2 = vrot.slane %v685_v52, %v3619_v30 }
 0x2b8   :  { %701 = vrot.lane.b32.xlu1 %v699_v2, %s3141_s0 }
 0x326   :  { %v688_v12 = vpop.permute.xlu1 %687 }
 0x327   :  { %v690_v46 = vmul.f32 %v688_v12, %v639_v51 }
 0x329   :  { %692 = vrot.lane.b32.xlu0 %v690_v46, %s3142_s4 }
 0x32a   :  { %v702_v54 = vpop.permute.xlu1 %701 }
 0x32b   :  { %v706_v7 = vmul.f32 %v702_v54, %v3542_v37  ;;  %v707_v62 = vmul.f32 %v702_v54, %v3547_v40  ;;  %v704_v39 = vmul.f32 %v702_v54, %v3540_v36  ;;  %v705_v18 = vmul.f32 %v702_v54, %v3537_v61 }
 0x32c   :  { %v710_v15 = vmul.f32 %v702_v54, %v3579_v5  ;;  %v711_v23 = vmul.f32 %v702_v54, %v3591_v31  ;;  %v708_v11 = vmul.f32 %v702_v54, %v3556_v14  ;;  %v709_v45 = vmul.f32 %v702_v54, %v3565_v48 }
 0x32d   :  { %v712_v29 = vmul.f32 %v702_v54, %v3602_v44  ;;  %v713_v50 = vmul.f32 %v702_v54, %v3599_v28 }
 0x39b   :  { %v693_v53 = vpop.permute.xlu0 %692 }
 0x39c   :  { %v695_v4 = vsub.f32 %v243_v41, %v693_v53 }
 0x39e   :  { %v717_v17 = vrot.slane %v695_v4, %v3619_v30 }
 0x3a0   :  { %719 = vrot.lane.b32.xlu0 %v717_v17, %s3141_s0 }
 0x412   :  { %v720_v26 = vpop.permute.xlu0 %719 }
 0x413   :  { %v724_v37 = vadd.f32 %v720_v26, %v706_v7  ;;  %v725_v51 = vadd.f32 %v720_v26, %v707_v62  ;;  %v722_v40 = vadd.f32 %v720_v26, %v704_v39  ;;  %v723_v34 = vadd.f32 %v720_v26, %v705_v18 }
 0x414   :  { %v728_v36 = vadd.f32 %v720_v26, %v710_v15  ;;  %v729_v27 = vadd.f32 %v720_v26, %v711_v23  ;;  %v726_v61 = vadd.f32 %v720_v26, %v708_v11  ;;  %v727_v59 = vadd.f32 %v720_v26, %v709_v45 }
 0x415   :  { %v734_v5 = vmax.f32 %v724_v37, 0.0  ;;  %v735_v35 = vmax.f32 %v725_v51, 0.0  ;;  %v732_v31 = vmax.f32 %v722_v40, 0.0  ;;  %v733_v58 = vmax.f32 %v723_v34, 0.0 }
 0x416   :  { %v738_v25 = vmax.f32 %v728_v36, 0.0  ;;  %v739_v14 = vmax.f32 %v729_v27, 0.0  ;;  %v736_v38 = vmax.f32 %v726_v61, 0.0  ;;  %v737_v48 = vmax.f32 %v727_v59, 0.0 }
 0x417   :  { %v743_v55 = vpack.c.bf16 %v735_v35, %v734_v5  ;;  %v742_v44 = vpack.c.bf16 %v733_v58, %v732_v31  ;;  %v730_v49 = vadd.f32 %v720_v26, %v712_v29  ;;  %v731_v28 = vadd.f32 %v720_v26, %v713_v50 }
 0x418   :  { %v745_v52 = vpack.c.bf16 %v739_v14, %v738_v25  ;;  %v744_v2 = vpack.c.bf16 %v737_v48, %v736_v38 }
 0x419   :  { %758 = vrot.lane.b32.xlu0 %v743_v55, %s3142_s4  ;;  %756 = vrot.lane.b32.xlu1 %v742_v44, %s3142_s4  ;;  %v740_v12 = vmax.f32 %v730_v49, 0.0  ;;  %v741_v46 = vmax.f32 %v731_v28, 0.0 }
 0x41b   :  { %v746_v41 = vpack.c.bf16 %v741_v46, %v740_v12 }
 0x41d   :  { %762 = vrot.lane.b32.xlu0 %v745_v52, %s3142_s4  ;;  %760 = vrot.lane.b32.xlu1 %v744_v2, %s3142_s4 }
 0x421   :  { %764 = vrot.lane.b32.xlu1 %v746_v41, %s3142_s4 }
 0x48b   :  { %v757_v53 = vpop.permute.xlu1 %756  ;;  %v759_v4 = vpop.permute.xlu0 %758 }
 0x48c   :  { %2905 = vmatmul.mubr.msk.bf16.vlgmr.msra.gmra.mrb[0].mxu1 %vm772_vm11, %v757_v53 }
 0x48d   :  { %2908 = vmatprep.mubr.msk.bf16.mxu1 %vm3139_vm0, %v3138_v0 }
 0x48f   :  { %v761_v17 = vpop.permute.xlu1 %760  ;;  %v763_v22 = vpop.permute.xlu0 %762 }
 0x493   :  { %v765_v54 = vpop.permute.xlu1 %764 }
 0x494   :  { %2909 = vmatmul.mubr.msk.bf16.gmra.mrb[4].mxu1 %vm772_vm11, %v759_v4 }
 0x495   :  { %2912 = vmatprep.mubr.msk.bf16.mxu1 %vm3139_vm0, %v3138_v0 }
 0x49c   :  { %2913 = vmatmul.mubr.msk.bf16.gmra.mrb[8].mxu1 %vm772_vm11, %v761_v17 }
 0x49d   :  { %2916 = vmatprep.mubr.msk.bf16.mxu1 %vm3139_vm0, %v3138_v0 }
 0x4a4   :  { %2917 = vmatmul.mubr.msk.bf16.gmra.mrb[12].mxu1 %vm772_vm11, %v763_v22 }
 0x4a5   :  { %2920 = vmatprep.mubr.msk.bf16.mxu1 %vm3139_vm0, %v3138_v0  ;;  %vm1061_vm0 = vcmask 523520  }
 0x4ac   :  { %2921 = vmatmul.mubr.msk.bf16.gmra.mrb[16].mxu1 %vm772_vm11, %v765_v54 }
 0x55f   :  { %v3661_v7 = vpop.f32.mrb[0].mxu1 }
 0x560   :  { %951 = vrot.lane.b32.xlu0 %v3661_v7, %s3143_s2  ;;  %v2906_v62 = vpop.f32.mrb[1].mxu1  ;;  %v861_v18 = vrot.slane %v3661_v7, 7 }
 0x561   :  { %v3665_v39 = vpop.f32.mrb[2].mxu1 }
 0x562   :  { %v862_v15 = vrot.slane %v3665_v39, 7  ;;  %953 = vrot.lane.b32.xlu1 %v3665_v39, %s3143_s2  ;;  %v2907_v0 = vpop.f32.mrb[3].mxu1 }
 0x564   :  { %v879_v23 = vsel %vm421_vm1, %v861_v18, %v862_v15 }
 0x565   :  { %v882_v17 = vmul.f32 %v3348_v60, %v879_v23 }
 0x567   :  { %v3673_v26 = vpop.f32.mrb[4].mxu1 }
 0x568   :  { %v863_v11 = vrot.slane %v3673_v26, 7  ;;  %955 = vrot.lane.b32.xlu0 %v3673_v26, %s3143_s2  ;;  %v2910_v45 = vpop.f32.mrb[5].mxu1 }
 0x569   :  { %v3678_v29 = vpop.f32.mrb[6].mxu1 }
 0x56a   :  { %v864_v50 = vrot.slane %v3678_v29, 7  ;;  %957 = vrot.lane.b32.xlu1 %v3678_v29, %s3143_s2  ;;  %v2911_v37 = vpop.f32.mrb[7].mxu1  ;;  %v878_v51 = vsel %vm421_vm1, %v862_v15, %v863_v11 }
 0x56b   :  { %v883_v53 = vmul.f32 %v3340_v56, %v878_v51 }
 0x56c   :  { %v877_v40 = vsel %vm421_vm1, %v863_v11, %v864_v50 }
 0x56d   :  { %v884_v15 = vmul.f32 %v3379_v9, %v877_v40 }
 0x56f   :  { %v3687_v34 = vpop.f32.mrb[8].mxu1 }
 0x570   :  { %v865_v36 = vrot.slane %v3687_v34, 7  ;;  %959 = vrot.lane.b32.xlu0 %v3687_v34, %s3143_s2  ;;  %v2914_v27 = vpop.f32.mrb[9].mxu1 }
 0x571   :  { %v3692_v61 = vpop.f32.mrb[10].mxu1 }
 0x572   :  { %v866_v59 = vrot.slane %v3692_v61, 7  ;;  %961 = vrot.lane.b32.xlu1 %v3692_v61, %s3143_s2  ;;  %v2915_v5 = vpop.f32.mrb[11].mxu1  ;;  %v876_v35 = vsel %vm421_vm1, %v864_v50, %v865_v36 }
 0x573   :  { %v885_v0 = vmul.f32 %v3391_v13, %v876_v35 }
 0x574   :  { %v875_v31 = vsel %vm421_vm1, %v865_v36, %v866_v59 }
 0x575   :  { %v886_v23 = vmul.f32 %v3399_v19, %v875_v31 }
 0x577   :  { %v3701_v58 = vpop.f32.mrb[12].mxu1 }
 0x578   :  { %v867_v25 = vrot.slane %v3701_v58, 7  ;;  %963 = vrot.lane.b32.xlu0 %v3701_v58, %s3143_s2  ;;  %v2918_v14 = vpop.f32.mrb[13].mxu1 }
 0x579   :  { %v3706_v38 = vpop.f32.mrb[14].mxu1 }
 0x57a   :  { %v868_v48 = vrot.slane %v3706_v38, 7  ;;  %965 = vrot.lane.b32.xlu1 %v3706_v38, %s3143_s2  ;;  %v2919_v55 = vpop.f32.mrb[15].mxu1  ;;  %v874_v44 = vsel %vm421_vm1, %v866_v59, %v867_v25 }
 0x57c   :  { %v873_v49 = vsel %vm421_vm1, %v867_v25, %v868_v48 }
 0x57d   :  { %v888_v5 = vmul.f32 %v3435_v43, %v873_v49 }
 0x57f   :  { %v3715_v28 = vpop.f32.mrb[16].mxu1 }
 0x580   :  { %v869_v52 = vrot.slane %v3715_v28, 7  ;;  %967 = vrot.lane.b32.xlu0 %v3715_v28, %s3143_s2  ;;  %v2922_v2 = vpop.f32.mrb[17].mxu1 }
 0x581   :  { %v3720_v12 = vpop.f32.mrb[18].mxu1 }
 0x582   :  { %v870_v46 = vrot.slane %v3720_v12, 7  ;;  %969 = vrot.lane.b32.xlu1 %v3720_v12, %s3143_s2  ;;  %v2923_v41 = vpop.f32.mrb[19].mxu1  ;;  %v872_v4 = vsel %vm421_vm1, %v868_v48, %v869_v52 }
 0x583   :  { %v889_v48 = vmul.f32 %v3451_v63, %v872_v4 }
 0x584   :  { %905 = vrot.lane.b32.xlu0 %v883_v53, %s3144_s23  ;;  %v880_v22 = vsel %vm421_vm1, %v870_v46, %v861_v18  ;;  %v871_v54 = vsel %vm421_vm1, %v869_v52, %v870_v46  ;;  %v887_v18 = vmul.f32 %v3406_v21, %v874_v44 }
 0x585   :  { %v881_v62 = vmul.f32 %v3361_v3, %v880_v22  ;;  %v890_v2 = vmul.f32 %v3469_v8, %v871_v54 }
 0x586   :  { %903 = vrot.lane.b32.xlu1 %v882_v17, %s3144_s23 }
 0x588   :  { %901 = vrot.lane.b32.xlu0 %v881_v62, %s3144_s23 }
 0x58a   :  { %907 = vrot.lane.b32.xlu1 %v884_v15, %s3144_s23 }
 0x58e   :  { %909 = vrot.lane.b32.xlu1 %v885_v0, %s3144_s23 }
 0x592   :  { %911 = vrot.lane.b32.xlu1 %v886_v23, %s3144_s23 }
 0x596   :  { %913 = vrot.lane.b32.xlu1 %v887_v18, %s3144_s23 }
 0x5d2   :  { %v952_v11 = vpop.permute.xlu0 %951 }
 0x5d3   :  { %v981_v50 = vrot.slane %v952_v11, 1 }
 0x5d4   :  { %v954_v45 = vpop.permute.xlu1 %953 }
 0x5d5   :  { %v982_v37 = vrot.slane %v954_v45, 1 }
 0x5d7   :  { %v999_v51 = vsel %vm542_vm10, %v981_v50, %v982_v37 }
 0x5d8   :  { %v1001_v40 = vmul.f32 %v3423_v33, %v999_v51 }
 0x5da   :  { %v956_v36 = vpop.permute.xlu0 %955  ;;  %1021 = vrot.lane.b32.xlu1 %v1001_v40, %s3144_s23 }
 0x5db   :  { %v983_v27 = vrot.slane %v956_v36, 1 }
 0x5dc   :  { %v958_v59 = vpop.permute.xlu1 %957 }
 0x5dd   :  { %v984_v35 = vrot.slane %v958_v59, 1  ;;  %v998_v31 = vsel %vm542_vm10, %v982_v37, %v983_v27 }
 0x5de   :  { %915 = vrot.lane.b32.xlu1 %v888_v5, %s3144_s23  ;;  %v1002_v25 = vmul.f32 %v3438_v47, %v998_v31 }
 0x5df   :  { %v997_v14 = vsel %vm542_vm10, %v983_v27, %v984_v35 }
 0x5e0   :  { %1023 = vrot.lane.b32.xlu0 %v1002_v25, %s3144_s23  ;;  %v1003_v44 = vmul.f32 %v3454_v1, %v997_v14 }
 0x5e2   :  { %v960_v55 = vpop.permute.xlu0 %959  ;;  %917 = vrot.lane.b32.xlu1 %v889_v48, %s3144_s23 }
 0x5e3   :  { %v985_v49 = vrot.slane %v960_v55, 1 }
 0x5e4   :  { %1025 = vrot.lane.b32.xlu0 %v1003_v44, %s3144_s23  ;;  %v962_v52 = vpop.permute.xlu1 %961 }
 0x5e5   :  { %v986_v46 = vrot.slane %v962_v52, 1  ;;  %v996_v41 = vsel %vm542_vm10, %v984_v35, %v985_v49 }
 0x5e6   :  { %919 = vrot.lane.b32.xlu1 %v890_v2, %s3144_s23  ;;  %v1004_v53 = vmul.f32 %v3466_v6, %v996_v41 }
 0x5e7   :  { %v995_v4 = vsel %vm542_vm10, %v985_v49, %v986_v46 }
 0x5e8   :  { %1027 = vrot.lane.b32.xlu0 %v1004_v53, %s3144_s23  ;;  %v1005_v22 = vmul.f32 %v3481_v20, %v995_v4 }
 0x5ea   :  { %v964_v17 = vpop.permute.xlu0 %963 }
 0x5eb   :  { %v987_v62 = vrot.slane %v964_v17, 1 }
 0x5ec   :  { %1029 = vrot.lane.b32.xlu0 %v1005_v22, %s3144_s23  ;;  %v966_v54 = vpop.permute.xlu1 %965 }
 0x5ed   :  { %v988_v15 = vrot.slane %v966_v54, 1  ;;  %v994_v0 = vsel %vm542_vm10, %v986_v46, %v987_v62 }
 0x5ee   :  { %v1006_v23 = vmul.f32 %v3491_v32, %v994_v0 }
 0x5ef   :  { %v993_v18 = vsel %vm542_vm10, %v987_v62, %v988_v15 }
 0x5f0   :  { %1031 = vrot.lane.b32.xlu0 %v1006_v23, %s3144_s23  ;;  %v1007_v45 = vmul.f32 %v3500_v10, %v993_v18 }
 0x5f2   :  { %v968_v11 = vpop.permute.xlu0 %967 }
 0x5f3   :  { %v989_v37 = vrot.slane %v968_v11, 1 }
 0x5f4   :  { %1033 = vrot.lane.b32.xlu0 %v1007_v45, %s3144_s23  ;;  %v970_v51 = vpop.permute.xlu1 %969 }
 0x5f5   :  { %v990_v40 = vrot.slane %v970_v51, 1  ;;  %v992_v36 = vsel %vm542_vm10, %v988_v15, %v989_v37 }
 0x5f6   :  { %v1008_v27 = vmul.f32 %v3509_v42, %v992_v36  ;;  %v906_v55 = vpop.permute.xlu0 %905 }
 0x5f7   :  { %v1000_v59 = vsel %vm542_vm10, %v990_v40, %v981_v50  ;;  %v991_v5 = vsel %vm542_vm10, %v989_v37, %v990_v40  ;;  %v933_v4 = vadd.f32 %v906_v55, %v3673_v26 }
 0x5f8   :  { %1035 = vrot.lane.b32.xlu0 %v1008_v27, %s3144_s23  ;;  %v1010_v35 = vmul.f32 %v3517_v24, %v1000_v59  ;;  %v1009_v31 = vmul.f32 %v3525_v57, %v991_v5  ;;  %v904_v25 = vpop.permute.xlu1 %903 }
 0x5f9   :  { %v932_v41 = vadd.f32 %v904_v25, %v3665_v39 }
 0x5fa   :  { %1039 = vrot.lane.b32.xlu1 %v1010_v35, %s3144_s23  ;;  %v902_v49 = vpop.permute.xlu0 %901 }
 0x5fb   :  { %v931_v17 = vadd.f32 %v902_v49, %v3661_v7 }
 0x5fc   :  { %1037 = vrot.lane.b32.xlu0 %v1009_v31, %s3144_s23  ;;  %v908_v14 = vpop.permute.xlu1 %907 }
 0x5fd   :  { %v934_v54 = vadd.f32 %v908_v14, %v3678_v29 }
 0x600   :  { %v910_v48 = vpop.permute.xlu1 %909 }
 0x601   :  { %v935_v18 = vadd.f32 %v910_v48, %v3687_v34 }
 0x604   :  { %v912_v44 = vpop.permute.xlu1 %911 }
 0x605   :  { %v936_v7 = vadd.f32 %v912_v44, %v3692_v61 }
 0x608   :  { %v914_v50 = vpop.permute.xlu1 %913 }
 0x609   :  { %v937_v5 = vadd.f32 %v914_v50, %v3701_v58 }
 0x64c   :  { %v1022_v2 = vpop.permute.xlu1 %1021 }
 0x64d   :  { %v3797_v15 = vadd.f32 %v1022_v2, %v931_v17 }
 0x64f   :  { %v1088_v26 = vmul.f32 %v3797_v15, %v3797_v15  ;;  %v1062_v34 = vsel %vm1061_vm0, %v3797_v15, 0.0 }
 0x650   :  { %v916_v62 = vpop.permute.xlu1 %915 }
 0x651   :  { %v1098_v31 = vsel %vm1061_vm0, %v1088_v26, 0.0 }
 0x652   :  { %v1024_v52 = vpop.permute.xlu0 %1023 }
 0x653   :  { %v3794_v22 = vadd.f32 %v1024_v52, %v932_v41 }
 0x654   :  { %v918_v51 = vpop.permute.xlu1 %917 }
 0x655   :  { %v1089_v39 = vmul.f32 %v3794_v22, %v3794_v22  ;;  %v1063_v29 = vsel %vm1061_vm0, %v3794_v22, 0.0 }
 0x656   :  { %v1026_v46 = vpop.permute.xlu0 %1025  ;;  %v1064_v35 = vadd.f32 %v1063_v29, %v1062_v34 }
 0x657   :  { %v3799_v0 = vadd.f32 %v1026_v46, %v933_v4  ;;  %v1099_v36 = vsel %vm1061_vm0, %v1089_v39, 0.0  ;;  %v938_v4 = vadd.f32 %v916_v62, %v3706_v38  ;;  %v939_v38 = vadd.f32 %v918_v51, %v3715_v28 }
 0x658   :  { %v1100_v55 = vadd.f32 %v1099_v36, %v1098_v31  ;;  %v920_v41 = vpop.permute.xlu1 %919 }
 0x659   :  { %v1090_v45 = vmul.f32 %v3799_v0, %v3799_v0  ;;  %v1065_v61 = vsel %vm1061_vm0, %v3799_v0, 0.0  ;;  %v940_v26 = vadd.f32 %v920_v41, %v3720_v12 }
 0x65a   :  { %v1028_v53 = vpop.permute.xlu0 %1027  ;;  %v1066_v44 = vadd.f32 %v1065_v61, %v1064_v35 }
 0x65b   :  { %v3804_v11 = vadd.f32 %v1028_v53, %v934_v54  ;;  %v1101_v25 = vsel %vm1061_vm0, %v1090_v45, 0.0 }
 0x65c   :  { %v1102_v46 = vadd.f32 %v1101_v25, %v1100_v55 }
 0x65d   :  { %v1091_v27 = vmul.f32 %v3804_v11, %v3804_v11  ;;  %v1067_v14 = vsel %vm1061_vm0, %v3804_v11, 0.0 }
 0x65e   :  { %v1030_v23 = vpop.permute.xlu0 %1029  ;;  %v1068_v53 = vadd.f32 %v1067_v14, %v1066_v44 }
 0x65f   :  { %v3813_v37 = vadd.f32 %v1030_v23, %v935_v18  ;;  %v1103_v52 = vsel %vm1061_vm0, %v1091_v27, 0.0 }
 0x660   :  { %v1104_v18 = vadd.f32 %v1103_v52, %v1102_v46 }
 0x661   :  { %v1092_v48 = vmul.f32 %v3813_v37, %v3813_v37  ;;  %v1069_v2 = vsel %vm1061_vm0, %v3813_v37, 0.0 }
 0x662   :  { %v1032_v40 = vpop.permute.xlu0 %1031  ;;  %v1070_v39 = vadd.f32 %v1069_v2, %v1068_v53 }
 0x663   :  { %v3822_v59 = vadd.f32 %v1032_v40, %v936_v7  ;;  %v1105_v17 = vsel %vm1061_vm0, %v1092_v48, 0.0 }
 0x664   :  { %v1106_v62 = vadd.f32 %v1105_v17, %v1104_v18 }
 0x665   :  { %v1093_v58 = vmul.f32 %v3822_v59, %v3822_v59  ;;  %v1071_v54 = vsel %vm1061_vm0, %v3822_v59, 0.0 }
 0x666   :  { %v1034_v49 = vpop.permute.xlu0 %1033  ;;  %v1072_v40 = vadd.f32 %v1071_v54, %v1070_v39 }
 0x667   :  { %v3836_v50 = vadd.f32 %v1034_v49, %v937_v5  ;;  %v1107_v29 = vsel %vm1061_vm0, %v1093_v58, 0.0 }
 0x668   :  { %v1108_v35 = vadd.f32 %v1107_v29, %v1106_v62 }
 0x669   :  { %v1094_v23 = vmul.f32 %v3836_v50, %v3836_v50  ;;  %v1073_v45 = vsel %vm1061_vm0, %v3836_v50, 0.0 }
 0x66a   :  { %v1036_v7 = vpop.permute.xlu0 %1035  ;;  %v1074_v31 = vadd.f32 %v1073_v45, %v1072_v40 }
 0x66b   :  { %v3848_v34 = vadd.f32 %v1036_v7, %v938_v4  ;;  %v1109_v61 = vsel %vm1061_vm0, %v1094_v23, 0.0 }
 0x66c   :  { %v1040_v36 = vpop.permute.xlu1 %1039  ;;  %v1110_v28 = vadd.f32 %v1109_v61, %v1108_v35 }
 0x66d   :  { %v1075_v27 = vsel %vm1061_vm0, %v3848_v34, 0.0  ;;  %v1095_v12 = vmul.f32 %v3848_v34, %v3848_v34  ;;  %v3856_v5 = vadd.f32 %v1040_v36, %v940_v26 }
 0x66e   :  { %v1038_v25 = vpop.permute.xlu0 %1037  ;;  %v1076_v51 = vadd.f32 %v1075_v27, %v1074_v31 }
 0x66f   :  { %v1111_v14 = vsel %vm1061_vm0, %v1095_v12, 0.0  ;;  %v3859_v48 = vadd.f32 %v1038_v25, %v939_v38  ;;  %v1097_v55 = vmul.f32 %v3856_v5, %v3856_v5  ;;  %v1079_v58 = vsel %vm1061_vm0, %v3856_v5, 0.0 }
 0x670   :  { %v1112_v52 = vadd.f32 %v1111_v14, %v1110_v28  ;;  %v747_v28 = vld [vmem:[%s4306_s6 + $0x2] ss:$0 sm:$0xff] }
 0x671   :  { %v1077_v44 = vsel %vm1061_vm0, %v3859_v48, 0.0  ;;  %v1096_v49 = vmul.f32 %v3859_v48, %v3859_v48  ;;  %v1115_v4 = vsel %vm1061_vm0, %v1097_v55, 0.0 }
 0x672   :  { %v1078_v2 = vadd.f32 %v1077_v44, %v1076_v51 }
 0x673   :  { %v1113_v46 = vsel %vm1061_vm0, %v1096_v49, 0.0 }
 0x674   :  { %v1080_v41 = vadd.f32 %v1079_v58, %v1078_v2  ;;  %v1114_v53 = vadd.f32 %v1113_v46, %v1112_v52  ;;  %v748_v2 = vld [vmem:[%s4306_s6 + $0x3] ss:$0 sm:$0xff] }
 0x676   :  { %v1081_v17 = vrot.slane %v1080_v41, 4  ;;  %v1116_v54 = vadd.f32 %v1115_v4, %v1114_v53  ;;  %v2979_v53 = vld [vmem:[%s4303_s3] ss:$8 sps:$4 sm:$0xff]   ;;  %v2981_v4 = vld [vmem:[%s4303_s3 + $0x4] ss:$8 sps:$4 sm:$0xff]  }
 0x677   :  { %1252 = vmatprep.subr.bf16.mxu1 %v2981_v4 }
 0x678   :  { %v1082_v23 = vadd.f32 %v1081_v17, %v1080_v41  ;;  %v1117_v18 = vrot.slane %v1116_v54, 4  ;;  %v2984_v17 = vld [vmem:[%s4303_s3 + $0x14] ss:$8 sps:$4 sm:$0xff]   ;;  %1253 = vmatpush1.bf16.msra.mxu1 %v2979_v53 }
 0x679   :  { %1254 = vmatprep.subr.bf16.mxu1 %v2984_v17 }
 0x67a   :  { %v1083_v39 = vrot.slane %v1082_v23, 2  ;;  %v1118_v7 = vadd.f32 %v1117_v18, %v1116_v54  ;;  %v3145_v54 = vmov 0  }
 0x67b   :  { %1284 = vmatprep.mubr.bf16.mxu1 %v3145_v54  ;;  %2963 = vset.pattern.permute.xlu1 %v3145_v54 }
 0x67c   :  { %v1084_v26 = vadd.f32 %v1083_v39, %v1082_v23  ;;  %v1119_v29 = vrot.slane %v1118_v7, 2  ;;  %v2982_v23 = vld [vmem:[%s4303_s3 + $0x10] ss:$8 sps:$4 sm:$0xff]   ;;  %2964 = vset.pattern.permute.xlu0 %v3145_v54 }
 0x67d   :  { %1255 = vmatpush1.bf16.msra.mxu1 %v2982_v23 }
 0x67e   :  { %v1085_v45 = vrot.slane %v1084_v26, 1  ;;  %v1120_v38 = vadd.f32 %v1119_v29, %v1118_v7 }
 0x680   :  { %v1086_v62 = vadd.f32 %v1085_v45, %v1084_v26  ;;  %v1121_v40 = vrot.slane %v1120_v38, 1 }
 0x682   :  { %v1087_v36 = vmul.f32 0.0125, %v1086_v62  ;;  %v1122_v61 = vadd.f32 %v1121_v40, %v1120_v38 }
 0x684   :  { %v1123_v27 = vmul.f32 0.0125, %v1122_v61  ;;  %v1124_v12 = vmul.f32 %v1087_v36, %v1087_v36 }
 0x686   :  { %v1125_v35 = vsub.f32 %v1123_v27, %v1124_v12 }
 0x688   :  { %v1126_v31 = vmax.f32 %v1125_v35, 0.0 }
 0x68a   :  { %v1127_v25 = vadd.f32 1e-05, %v1126_v31 }
 0x68c   :  { %3099 = vrsqrt.f32 %v1127_v25 }
 0x696   :  { %v3100_v14 = vpop.eup %3099 }
 0x697   :  { %1130 = vrot.lane.b32.xlu0 %v3100_v14, %s3140_s16 }
 0x709   :  { %v1131_v51 = vpop.permute.xlu0 %1130 }
 0x70a   :  { %v1133_v55 = vmul.f32 %v1131_v51, %v747_v28 }
 0x70c   :  { %1135 = vrot.lane.b32.xlu1 %v1133_v55, %s3144_s23  ;;  %v1147_v44 = vrot.slane %v1133_v55, %v3619_v30 }
 0x710   :  { %1149 = vrot.lane.b32.xlu1 %v1147_v44, %s3144_s23 }
 0x77e   :  { %v1136_v49 = vpop.permute.xlu1 %1135 }
 0x77f   :  { %v1138_v52 = vmul.f32 %v1136_v49, %v1087_v36 }
 0x781   :  { %1140 = vrot.lane.b32.xlu0 %v1138_v52, %s3140_s16 }
 0x782   :  { %v1150_v18 = vpop.permute.xlu1 %1149 }
 0x783   :  { %v1154_v39 = vmul.f32 %v1150_v18, %v3799_v0  ;;  %v1155_v7 = vmul.f32 %v1150_v18, %v3804_v11  ;;  %v1152_v26 = vmul.f32 %v1150_v18, %v3797_v15  ;;  %v1153_v29 = vmul.f32 %v1150_v18, %v3794_v22 }
 0x784   :  { %v1158_v45 = vmul.f32 %v1150_v18, %v3836_v50  ;;  %v1159_v38 = vmul.f32 %v1150_v18, %v3848_v34  ;;  %v1156_v40 = vmul.f32 %v1150_v18, %v3813_v37  ;;  %v1157_v36 = vmul.f32 %v1150_v18, %v3822_v59 }
 0x785   :  { %v1160_v61 = vmul.f32 %v1150_v18, %v3859_v48  ;;  %v1161_v27 = vmul.f32 %v1150_v18, %v3856_v5 }
 0x7f3   :  { %v1141_v58 = vpop.permute.xlu0 %1140 }
 0x7f4   :  { %v1143_v46 = vsub.f32 %v748_v2, %v1141_v58 }
 0x7f6   :  { %v1165_v41 = vrot.slane %v1143_v46, %v3619_v30 }
 0x7f8   :  { %1167 = vrot.lane.b32.xlu0 %v1165_v41, %s3144_s23 }
 0x86a   :  { %v1168_v62 = vpop.permute.xlu0 %1167 }
 0x86b   :  { %v1172_v0 = vadd.f32 %v1168_v62, %v1154_v39  ;;  %v1173_v12 = vadd.f32 %v1168_v62, %v1155_v7  ;;  %v1170_v11 = vadd.f32 %v1168_v62, %v1152_v26  ;;  %v1171_v35 = vadd.f32 %v1168_v62, %v1153_v29 }
 0x86c   :  { %v1176_v15 = vadd.f32 %v1168_v62, %v1158_v45  ;;  %v1177_v31 = vadd.f32 %v1168_v62, %v1159_v38  ;;  %v1174_v22 = vadd.f32 %v1168_v62, %v1156_v40  ;;  %v1175_v25 = vadd.f32 %v1168_v62, %v1157_v36 }
 0x86d   :  { %v1182_v50 = vmax.f32 %v1172_v0, 0.0  ;;  %v1183_v14 = vmax.f32 %v1173_v12, 0.0  ;;  %v1180_v34 = vmax.f32 %v1170_v11, 0.0  ;;  %v1181_v28 = vmax.f32 %v1171_v35, 0.0 }
 0x86e   :  { %v1186_v51 = vmax.f32 %v1176_v15, 0.0  ;;  %v1187_v37 = vmax.f32 %v1177_v31, 0.0  ;;  %v1184_v55 = vmax.f32 %v1174_v22, 0.0  ;;  %v1185_v59 = vmax.f32 %v1175_v25, 0.0 }
 0x86f   :  { %v1191_v44 = vpack.c.bf16 %v1183_v14, %v1182_v50  ;;  %v1190_v48 = vpack.c.bf16 %v1181_v28, %v1180_v34  ;;  %v1178_v49 = vadd.f32 %v1168_v62, %v1160_v61  ;;  %v1179_v5 = vadd.f32 %v1168_v62, %v1161_v27 }
 0x870   :  { %v1193_v52 = vpack.c.bf16 %v1187_v37, %v1186_v51  ;;  %v1192_v2 = vpack.c.bf16 %v1185_v59, %v1184_v55 }
 0x871   :  { %1208 = vrot.lane.b32.xlu0 %v1191_v44, %s3140_s16  ;;  %1206 = vrot.lane.b32.xlu1 %v1190_v48, %s3140_s16  ;;  %v1188_v58 = vmax.f32 %v1178_v49, 0.0  ;;  %v1189_v46 = vmax.f32 %v1179_v5, 0.0 }
 0x873   :  { %v1194_v41 = vpack.c.bf16 %v1189_v46, %v1188_v58 }
 0x875   :  { %1212 = vrot.lane.b32.xlu0 %v1193_v52, %s3140_s16  ;;  %1210 = vrot.lane.b32.xlu1 %v1192_v2, %s3140_s16 }
 0x879   :  { %1214 = vrot.lane.b32.xlu1 %v1194_v41, %s3140_s16 }
 0x8e3   :  { %v1207_v53 = vpop.permute.xlu1 %1206  ;;  %v1209_v4 = vpop.permute.xlu0 %1208 }
 0x8e4   :  { %2739 = vmatmul.mubr.msk.bf16.vlgmr.msra.gmra.mrb[20].mxu1 %vm1236_vm12, %v1207_v53 }
 0x8e5   :  { %1294 = vmatprep.mubr.bf16.mxu1 %v3145_v54 }
 0x8e7   :  { %v1211_v17 = vpop.permute.xlu1 %1210  ;;  %v1213_v23 = vpop.permute.xlu0 %1212 }
 0x8eb   :  { %v1215_v18 = vpop.permute.xlu1 %1214 }
 0x8ec   :  { %2740 = vmatmul.mubr.msk.bf16.gmra.mrb[24].mxu1 %vm1236_vm12, %v1209_v4 }
 0x8ed   :  { %1304 = vmatprep.mubr.bf16.mxu1 %v3145_v54 }
 0x8f4   :  { %2741 = vmatmul.mubr.msk.bf16.gmra.mrb[28].mxu1 %vm1236_vm12, %v1211_v17 }
 0x8f5   :  { %1314 = vmatprep.mubr.bf16.mxu1 %v3145_v54 }
 0x8fc   :  { %2742 = vmatmul.mubr.msk.bf16.gmra.mrb[32].mxu1 %vm1236_vm12, %v1213_v23 }
 0x8fd   :  { %1324 = vmatprep.mubr.bf16.mxu1 %v3145_v54 }
 0x904   :  { %2743 = vmatmul.mubr.msk.bf16.gmra.mrb[36].mxu1 %vm1236_vm12, %v1215_v18 }
 0x9b7   :  { %v3911_v39 = vpop.f32.mrb[20].mxu1 }
 0x9b8   :  { %v3913_v7 = vpop.f32.mrb[21].mxu1  ;;  %v1335_v29 = vrot.slane %v3911_v39, 7 }
 0x9b9   :  { %v3915_v26 = vpop.f32.mrb[22].mxu1  ;;  %v1415_v62 = vrot.slane %v3913_v7, 1 }
 0x9ba   :  { %v1336_v45 = vrot.slane %v3915_v26, 7  ;;  %v1292_v38 = vpop.f32.mrb[23].mxu1 }
 0x9bb   :  { %v1416_v40 = vrot.slane %v1292_v38, 1 }
 0x9bc   :  { %v1353_v54 = vsel %vm421_vm1, %v1335_v29, %v1336_v45 }
 0x9bd   :  { %v1356_v36 = vmul.f32 %v3348_v60, %v1353_v54  ;;  %v1433_v61 = vsel %vm542_vm10, %v1415_v62, %v1416_v40 }
 0x9be   :  { %v1435_v15 = vmul.f32 %v3423_v33, %v1433_v61 }
 0x9bf   :  { %1377 = vrot.lane.b32.xlu1 %v1356_v36, %s3143_s2  ;;  %v3930_v27 = vpop.f32.mrb[24].mxu1 }
 0x9c0   :  { %v1337_v0 = vrot.slane %v3930_v27, 7  ;;  %v1298_v12 = vpop.f32.mrb[25].mxu1 }
 0x9c1   :  { %v1417_v11 = vrot.slane %v1298_v12, 1  ;;  %v3933_v35 = vpop.f32.mrb[26].mxu1 }
 0x9c2   :  { %v1338_v31 = vrot.slane %v3933_v35, 7  ;;  %v1302_v60 = vpop.f32.mrb[27].mxu1  ;;  %v1352_v22 = vsel %vm421_vm1, %v1336_v45, %v1337_v0 }
 0x9c3   :  { %v1418_v25 = vrot.slane %v1302_v60, 1  ;;  %1455 = vrot.lane.b32.xlu1 %v1435_v15, %s3143_s2  ;;  %v1357_v50 = vmul.f32 %v3340_v56, %v1352_v22  ;;  %v1432_v14 = vsel %vm542_vm10, %v1416_v40, %v1417_v11 }
 0x9c4   :  { %v1351_v34 = vsel %vm421_vm1, %v1337_v0, %v1338_v31  ;;  %v1436_v37 = vmul.f32 %v3438_v47, %v1432_v14 }
 0x9c5   :  { %1379 = vrot.lane.b32.xlu0 %v1357_v50, %s3143_s2  ;;  %v1358_v33 = vmul.f32 %v3379_v9, %v1351_v34  ;;  %v1431_v28 = vsel %vm542_vm10, %v1417_v11, %v1418_v25 }
 0x9c6   :  { %v1437_v52 = vmul.f32 %v3454_v1, %v1431_v28 }
 0x9c7   :  { %1381 = vrot.lane.b32.xlu1 %v1358_v33, %s3143_s2  ;;  %v3950_v51 = vpop.f32.mrb[28].mxu1 }
 0x9c8   :  { %v1339_v56 = vrot.slane %v3950_v51, 7  ;;  %v1308_v55 = vpop.f32.mrb[29].mxu1 }
 0x9c9   :  { %v1419_v59 = vrot.slane %v1308_v55, 1  ;;  %1457 = vrot.lane.b32.xlu0 %v1436_v37, %s3143_s2  ;;  %v3955_v44 = vpop.f32.mrb[30].mxu1 }
 0x9ca   :  { %v1340_v48 = vrot.slane %v3955_v44, 7  ;;  %v1312_v9 = vpop.f32.mrb[31].mxu1  ;;  %v1350_v49 = vsel %vm421_vm1, %v1338_v31, %v1339_v56 }
 0x9cb   :  { %v1420_v5 = vrot.slane %v1312_v9, 1  ;;  %v1359_v2 = vmul.f32 %v3391_v13, %v1350_v49  ;;  %v1430_v47 = vsel %vm542_vm10, %v1418_v25, %v1419_v59 }
 0x9cc   :  { %v1349_v58 = vsel %vm421_vm1, %v1339_v56, %v1340_v48  ;;  %v1438_v53 = vmul.f32 %v3466_v6, %v1430_v47 }
 0x9cd   :  { %1459 = vrot.lane.b32.xlu0 %v1437_v52, %s3143_s2  ;;  %1383 = vrot.lane.b32.xlu1 %v1359_v2, %s3143_s2  ;;  %v1429_v46 = vsel %vm542_vm10, %v1419_v59, %v1420_v5  ;;  %v1360_v1 = vmul.f32 %v3399_v19, %v1349_v58 }
 0x9ce   :  { %v1439_v6 = vmul.f32 %v3481_v20, %v1429_v46 }
 0x9cf   :  { %v3970_v41 = vpop.f32.mrb[32].mxu1 }
 0x9d0   :  { %v1341_v13 = vrot.slane %v3970_v41, 7  ;;  %v1318_v4 = vpop.f32.mrb[33].mxu1 }
 0x9d1   :  { %v1421_v17 = vrot.slane %v1318_v4, 1  ;;  %1461 = vrot.lane.b32.xlu0 %v1438_v53, %s3143_s2  ;;  %1385 = vrot.lane.b32.xlu1 %v1360_v1, %s3143_s2  ;;  %v3977_v23 = vpop.f32.mrb[34].mxu1 }
 0x9d2   :  { %v1342_v18 = vrot.slane %v3977_v23, 7  ;;  %v1322_v45 = vpop.f32.mrb[35].mxu1  ;;  %v1348_v38 = vsel %vm421_vm1, %v1340_v48, %v1341_v13 }
 0x9d3   :  { %v1422_v40 = vrot.slane %v1322_v45, 1  ;;  %v1361_v19 = vmul.f32 %v3406_v21, %v1348_v38  ;;  %v1428_v54 = vsel %vm542_vm10, %v1420_v5, %v1421_v17 }
 0x9d4   :  { %v1347_v36 = vsel %vm421_vm1, %v1341_v13, %v1342_v18 }
 0x9d5   :  { %1463 = vrot.lane.b32.xlu0 %v1439_v6, %s3143_s2  ;;  %1387 = vrot.lane.b32.xlu1 %v1361_v19, %s3143_s2  ;;  %v1427_v61 = vsel %vm542_vm10, %v1421_v17, %v1422_v40  ;;  %v1362_v12 = vmul.f32 %v3435_v43, %v1347_v36 }
 0x9d6   :  { %v1441_v7 = vmul.f32 %v3500_v10, %v1427_v61 }
 0x9d7   :  { %v3992_v0 = vpop.f32.mrb[36].mxu1 }
 0x9d8   :  { %v1343_v20 = vrot.slane %v3992_v0, 7  ;;  %v1328_v21 = vpop.f32.mrb[37].mxu1 }
 0x9d9   :  { %v1423_v11 = vrot.slane %v1328_v21, 1  ;;  %1389 = vrot.lane.b32.xlu1 %v1362_v12, %s3143_s2  ;;  %v3997_v15 = vpop.f32.mrb[38].mxu1 }
 0x9da   :  { %v1344_v31 = vrot.slane %v3997_v15, 7  ;;  %v1332_v60 = vpop.f32.mrb[39].mxu1  ;;  %v1346_v22 = vsel %vm421_vm1, %v1342_v18, %v1343_v20 }
 0x9db   :  { %v1424_v25 = vrot.slane %v1332_v60, 1  ;;  %v1363_v50 = vmul.f32 %v3451_v63, %v1346_v22  ;;  %v1426_v43 = vsel %vm542_vm10, %v1422_v40, %v1423_v11 }
 0x9dc   :  { %v1354_v14 = vsel %vm421_vm1, %v1344_v31, %v1335_v29  ;;  %v1345_v34 = vsel %vm421_vm1, %v1343_v20, %v1344_v31  ;;  %v1440_v29 = vmul.f32 %v3491_v32, %v1428_v54  ;;  %vm1495_vm1 = vcmask 1048064  }
 0x9dd   :  { %v1425_v33 = vsel %vm542_vm10, %v1423_v11, %v1424_v25  ;;  %v1434_v28 = vsel %vm542_vm10, %v1424_v25, %v1415_v62  ;;  %1391 = vrot.lane.b32.xlu1 %v1363_v50, %s3143_s2  ;;  %v1355_v63 = vmul.f32 %v3361_v3, %v1354_v14  ;;  %v1364_v37 = vmul.f32 %v3469_v8, %v1345_v34 }
 0x9de   :  { %v1444_v56 = vmul.f32 %v3517_v24, %v1434_v28  ;;  %v1442_v3 = vmul.f32 %v3509_v42, %v1426_v43  ;;  %v1443_v8 = vmul.f32 %v3525_v57, %v1425_v33  ;;  %vm1664_vm10 = vcmask 523264  }
 0x9df   :  { %1375 = vrot.lane.b32.xlu0 %v1355_v63, %s3143_s2 }
 0x9e1   :  { %1393 = vrot.lane.b32.xlu1 %v1364_v37, %s3143_s2 }
 0x9e3   :  { %1465 = vrot.lane.b32.xlu0 %v1440_v29, %s3143_s2 }
 0x9e5   :  { %1473 = vrot.lane.b32.xlu1 %v1444_v56, %s3143_s2 }
 0x9e7   :  { %1467 = vrot.lane.b32.xlu0 %v1441_v7, %s3143_s2 }
 0x9eb   :  { %1469 = vrot.lane.b32.xlu0 %v1442_v3, %s3143_s2 }
 0x9ef   :  { %1471 = vrot.lane.b32.xlu0 %v1443_v8, %s3143_s2 }
 0xa31   :  { %v1378_v62 = vpop.permute.xlu1 %1377 }
 0xa32   :  { %v1406_v2 = vadd.f32 %v1378_v62, %v3915_v26 }
 0xa35   :  { %v1456_v32 = vpop.permute.xlu1 %1455 }
 0xa37   :  { %v1380_v55 = vpop.permute.xlu0 %1379 }
 0xa38   :  { %v1407_v57 = vadd.f32 %v1380_v55, %v3930_v27 }
 0xa39   :  { %v1382_v24 = vpop.permute.xlu1 %1381 }
 0xa3a   :  { %v1408_v53 = vadd.f32 %v1382_v24, %v3933_v35 }
 0xa3b   :  { %v1458_v59 = vpop.permute.xlu0 %1457 }
 0xa3c   :  { %v4033_v47 = vadd.f32 %v1458_v59, %v1406_v2 }
 0xa3e   :  { %v1523_v4 = vmul.f32 %v4033_v47, %v4033_v47  ;;  %v1497_v27 = vsel %vm1495_vm1, %v4033_v47, 0.0 }
 0xa3f   :  { %v1384_v48 = vpop.permute.xlu1 %1383  ;;  %v1460_v9 = vpop.permute.xlu0 %1459 }
 0xa40   :  { %v4037_v1 = vadd.f32 %v1460_v9, %v1407_v57  ;;  %v1409_v17 = vadd.f32 %v1384_v48, %v3950_v51  ;;  %v1533_v6 = vsel %vm1495_vm1, %v1523_v4, 0.0 }
 0xa42   :  { %v1524_v38 = vmul.f32 %v4037_v1, %v4037_v1  ;;  %v1499_v19 = vsel %vm1495_vm1, %v4037_v1, 0.0 }
 0xa43   :  { %v1386_v49 = vpop.permute.xlu1 %1385  ;;  %v1462_v5 = vpop.permute.xlu0 %1461 }
 0xa44   :  { %v4043_v26 = vadd.f32 %v1462_v5, %v1408_v53  ;;  %v1535_v22 = vsel %vm1495_vm1, %v1524_v38, 0.0 }
 0xa46   :  { %v1525_v61 = vmul.f32 %v4043_v26, %v4043_v26  ;;  %v1501_v25 = vsel %vm1495_vm1, %v4043_v26, 0.0 }
 0xa47   :  { %v1388_v10 = vpop.permute.xlu1 %1387  ;;  %v1464_v42 = vpop.permute.xlu0 %1463 }
 0xa48   :  { %v4049_v45 = vadd.f32 %v1464_v42, %v1409_v17  ;;  %v1411_v12 = vadd.f32 %v1388_v10, %v3970_v41  ;;  %v1537_v41 = vsel %vm1495_vm1, %v1525_v61, 0.0 }
 0xa4a   :  { %v1526_v21 = vmul.f32 %v4049_v45, %v4049_v45  ;;  %v1503_v34 = vsel %vm1495_vm1, %v4049_v45, 0.0 }
 0xa4b   :  { %v1390_v52 = vpop.permute.xlu1 %1389 }
 0xa4c   :  { %v1412_v33 = vadd.f32 %v1390_v52, %v3977_v23  ;;  %v1539_v63 = vsel %vm1495_vm1, %v1526_v21, 0.0 }
 0xa4f   :  { %v1392_v58 = vpop.permute.xlu1 %1391 }
 0xa50   :  { %v1413_v23 = vadd.f32 %v1392_v58, %v3992_v0 }
 0xa51   :  { %v1376_v46 = vpop.permute.xlu0 %1375 }
 0xa52   :  { %v1405_v13 = vadd.f32 %v1376_v46, %v3911_v39  ;;  %v1410_v39 = vadd.f32 %v1386_v49, %v3955_v44 }
 0xa53   :  { %v1394_v36 = vpop.permute.xlu1 %1393 }
 0xa54   :  { %v4045_v18 = vadd.f32 %v1456_v32, %v1405_v13  ;;  %v1414_v3 = vadd.f32 %v1394_v36, %v3997_v15 }
 0xa55   :  { %v1466_v35 = vpop.permute.xlu0 %1465 }
 0xa56   :  { %v1496_v40 = vsel %vm1495_vm1, %v4045_v18, 0.0  ;;  %v1522_v51 = vmul.f32 %v4045_v18, %v4045_v18  ;;  %v4065_v20 = vadd.f32 %v1466_v35, %v1410_v39 }
 0xa57   :  { %v1498_v54 = vadd.f32 %v1497_v27, %v1496_v40  ;;  %v1474_v56 = vpop.permute.xlu1 %1473 }
 0xa58   :  { %v1532_v44 = vsel %vm1495_vm1, %v1522_v51, 0.0  ;;  %v1527_v28 = vmul.f32 %v4065_v20, %v4065_v20  ;;  %v1505_v8 = vsel %vm1495_vm1, %v4065_v20, 0.0  ;;  %v4090_v48 = vadd.f32 %v1474_v56, %v1414_v3 }
 0xa59   :  { %v1500_v11 = vadd.f32 %v1499_v19, %v1498_v54  ;;  %v1534_v31 = vadd.f32 %v1533_v6, %v1532_v44  ;;  %v1468_v60 = vpop.permute.xlu0 %1467 }
 0xa5a   :  { %v4072_v50 = vadd.f32 %v1468_v60, %v1411_v12  ;;  %v1541_v59 = vsel %vm1495_vm1, %v1527_v28, 0.0  ;;  %v1531_v58 = vmul.f32 %v4090_v48, %v4090_v48  ;;  %v1513_v27 = vsel %vm1495_vm1, %v4090_v48, 0.0 }
 0xa5b   :  { %v1536_v43 = vadd.f32 %v1535_v22, %v1534_v31  ;;  %v1502_v14 = vadd.f32 %v1501_v25, %v1500_v11 }
 0xa5c   :  { %v1528_v62 = vmul.f32 %v4072_v50, %v4072_v50  ;;  %v1507_v9 = vsel %vm1495_vm1, %v4072_v50, 0.0  ;;  %v1549_v40 = vsel %vm1495_vm1, %v1531_v58, 0.0 }
 0xa5d   :  { %v1504_v37 = vadd.f32 %v1503_v34, %v1502_v14  ;;  %v1538_v29 = vadd.f32 %v1537_v41, %v1536_v43  ;;  %v1470_v7 = vpop.permute.xlu0 %1469 }
 0xa5e   :  { %v4086_v32 = vadd.f32 %v1470_v7, %v1412_v33  ;;  %v1543_v52 = vsel %vm1495_vm1, %v1528_v62, 0.0 }
 0xa5f   :  { %v1506_v55 = vadd.f32 %v1505_v8, %v1504_v37  ;;  %v1540_v24 = vadd.f32 %v1539_v63, %v1538_v29  ;;  %v1195_v63 = vld [vmem:[%s4306_s6 + $0x4] ss:$0 sm:$0xff]  ;;  %v1196_v8 = vld [vmem:[%s4306_s6 + $0x5] ss:$0 sm:$0xff] }
 0xa60   :  { %v1529_v15 = vmul.f32 %v4086_v32, %v4086_v32  ;;  %v1509_v0 = vsel %vm1495_vm1, %v4086_v32, 0.0 }
 0xa61   :  { %v1542_v49 = vadd.f32 %v1541_v59, %v1540_v24  ;;  %v1508_v5 = vadd.f32 %v1507_v9, %v1506_v55  ;;  %v1472_v10 = vpop.permute.xlu0 %1471 }
 0xa62   :  { %v4099_v2 = vadd.f32 %v1472_v10, %v1413_v23  ;;  %v1545_v46 = vsel %vm1495_vm1, %v1529_v15, 0.0 }
 0xa63   :  { %v1544_v42 = vadd.f32 %v1543_v52, %v1542_v49  ;;  %v1510_v57 = vadd.f32 %v1509_v0, %v1508_v5 }
 0xa64   :  { %v1511_v53 = vsel %vm1495_vm1, %v4099_v2, 0.0  ;;  %v1530_v13 = vmul.f32 %v4099_v2, %v4099_v2 }
 0xa65   :  { %v1546_v4 = vadd.f32 %v1545_v46, %v1544_v42  ;;  %v1512_v17 = vadd.f32 %v1511_v53, %v1510_v57 }
 0xa66   :  { %v1547_v35 = vsel %vm1495_vm1, %v1530_v13, 0.0 }
 0xa67   :  { %v1514_v38 = vadd.f32 %v1513_v27, %v1512_v17  ;;  %v1548_v39 = vadd.f32 %v1547_v35, %v1546_v4 }
 0xa69   :  { %v1515_v51 = vrot.slane %v1514_v38, 4  ;;  %v1550_v6 = vadd.f32 %v1549_v40, %v1548_v39 }
 0xa6b   :  { %v1516_v19 = vadd.f32 %v1515_v51, %v1514_v38  ;;  %v1551_v54 = vrot.slane %v1550_v6, 4 }
 0xa6d   :  { %v1517_v36 = vrot.slane %v1516_v19, 2  ;;  %v1552_v61 = vadd.f32 %v1551_v54, %v1550_v6  ;;  %v2987_v54 = vld [vmem:[#allocation3 + $0x4] ss:$8 sps:$4 sm:$0xff]  }
 0xa6e   :  { %2411 = vmatprep.subr.bf16.mxu1 %v2987_v54 }
 0xa6f   :  { %v1518_v12 = vadd.f32 %v1517_v36, %v1516_v19  ;;  %v1553_v44 = vrot.slane %v1552_v61, 2  ;;  %v2985_v19 = vld [vmem:[#allocation3] ss:$8 sps:$4 sm:$0xff]   ;;  %v2990_v36 = vld [vmem:[#allocation3 + $0x14] ss:$8 sps:$4 sm:$0xff]  }
 0xa70   :  { %2412 = vmatpush1.bf16.msra.mxu1 %v2985_v19 }
 0xa71   :  { %v1519_v21 = vrot.slane %v1518_v12, 1  ;;  %v1554_v11 = vadd.f32 %v1553_v44, %v1552_v61  ;;  %v2993_v61 = vld [vmem:[#allocation3 + $0x104] ss:$8 sps:$4 sm:$0xff]   ;;  %2413 = vmatprep.subr.bf16.mxu1 %v2990_v36 }
 0xa72   :  { %2454 = vmatprep.subr.bf16.mxu0 %v2993_v61  ;;  %v2996_v44 = vld [vmem:[#allocation3 + $0x24] ss:$8 sps:$4 sm:$0xff]  }
 0xa73   :  { %v1520_v31 = vadd.f32 %v1519_v21, %v1518_v12  ;;  %v1555_v60 = vrot.slane %v1554_v11, 1  ;;  %v2999_v12 = vld [vmem:[#allocation3 + $0x114] ss:$8 sps:$4 sm:$0xff]   ;;  %v2997_v21 = vld [vmem:[#allocation3 + $0x110] ss:$8 sps:$4 sm:$0xff]  }
 0xa75   :  { %v1521_v22 = vmul.f32 0.0125, %v1520_v31  ;;  %v1556_v25 = vadd.f32 %v1555_v60, %v1554_v11  ;;  %v3005_v11 = vld [vmem:[#allocation3 + $0x124] ss:$8 sps:$4 sm:$0xff]   ;;  %v2994_v31 = vld [vmem:[#allocation3 + $0x20] ss:$8 sps:$4 sm:$0xff]  }
 0xa76   :  { %v3002_v60 = vld [vmem:[#allocation3 + $0x34] ss:$8 sps:$4 sm:$0xff]  }
 0xa77   :  { %v1557_v43 = vmul.f32 0.0125, %v1556_v25  ;;  %v1558_v14 = vmul.f32 %v1521_v22, %v1521_v22  ;;  %v3011_v25 = vld [vmem:[#allocation3 + $0x134] ss:$8 sps:$4 sm:$0xff]  }
 0xa79   :  { %v1559_v41 = vsub.f32 %v1557_v43, %v1558_v14  ;;  %v3000_v43 = vld [vmem:[#allocation3 + $0x30] ss:$8 sps:$4 sm:$0xff]   ;;  %v3008_v14 = vld [vmem:[#allocation3 + $0x44] ss:$8 sps:$4 sm:$0xff]  }
 0xa7b   :  { %v1560_v34 = vmax.f32 %v1559_v41, 0.0  ;;  %v3009_v41 = vld [vmem:[#allocation3 + $0x130] ss:$8 sps:$4 sm:$0xff]  }
 0xa7d   :  { %v1561_v33 = vadd.f32 1e-05, %v1560_v34  ;;  %v3017_v34 = vld [vmem:[#allocation3 + $0x144] ss:$8 sps:$4 sm:$0xff]  }
 0xa7f   :  { %3101 = vrsqrt.f32 %v1561_v33  ;;  %v3006_v33 = vld [vmem:[#allocation3 + $0x40] ss:$8 sps:$4 sm:$0xff]  }
 0xa89   :  { %v3102_v28 = vpop.eup %3101 }
 0xa8a   :  { %1564 = vrot.lane.b32.xlu0 %v3102_v28, %s3143_s2  ;;  %v3014_v28 = vld [vmem:[#allocation3 + $0x54] ss:$8 sps:$4 sm:$0xff]  }
 0xafc   :  { %v1565_v37 = vpop.permute.xlu0 %1564 }
 0xafd   :  { %v1567_v29 = vmul.f32 %v1565_v37, %v1195_v63  ;;  %v3015_v63 = vld [vmem:[#allocation3 + $0x140] ss:$8 sps:$4 sm:$0xff]   ;;  %v3023_v37 = vld [vmem:[#allocation3 + $0x154] ss:$8 sps:$4 sm:$0xff]  }
 0xaff   :  { %1569 = vrot.lane.b32.xlu1 %v1567_v29, %s3143_s2  ;;  %v1581_v56 = vrot.slane %v1567_v29, %v3619_v30  ;;  %v3012_v29 = vld [vmem:[#allocation3 + $0x50] ss:$8 sps:$4 sm:$0xff]  }
 0xb03   :  { %1583 = vrot.lane.b32.xlu1 %v1581_v56, %s3143_s2  ;;  %v3020_v56 = vld [vmem:[#allocation3 + $0x64] ss:$8 sps:$4 sm:$0xff]  }
 0xb71   :  { %v1570_v7 = vpop.permute.xlu1 %1569 }
 0xb72   :  { %v1572_v3 = vmul.f32 %v1570_v7, %v1521_v22  ;;  %v3003_v22 = vld [vmem:[#allocation3 + $0x120] ss:$8 sps:$4 sm:$0xff]   ;;  %v3021_v7 = vld [vmem:[#allocation3 + $0x150] ss:$8 sps:$4 sm:$0xff]  }
 0xb74   :  { %1574 = vrot.lane.b32.xlu0 %v1572_v3, %s3143_s2  ;;  %v3029_v3 = vld [vmem:[#allocation3 + $0x164] ss:$8 sps:$4 sm:$0xff]  }
 0xb75   :  { %v1584_v24 = vpop.permute.xlu1 %1583 }
 0xb76   :  { %v1588_v59 = vmul.f32 %v1584_v24, %v4037_v1  ;;  %v1587_v9 = vmul.f32 %v1584_v24, %v4033_v47  ;;  %v1589_v10 = vmul.f32 %v1584_v24, %v4043_v26  ;;  %v1586_v52 = vmul.f32 %v1584_v24, %v4045_v18 }
 0xb77   :  { %v1591_v46 = vmul.f32 %v1584_v24, %v4065_v20  ;;  %v1590_v1 = vmul.f32 %v1584_v24, %v4049_v45  ;;  %v1593_v26 = vmul.f32 %v1584_v24, %v4086_v32  ;;  %v1592_v18 = vmul.f32 %v1584_v24, %v4072_v50 }
 0xb78   :  { %v1594_v45 = vmul.f32 %v1584_v24, %v4099_v2  ;;  %v1595_v20 = vmul.f32 %v1584_v24, %v4090_v48  ;;  %v2991_v2 = vld [vmem:[#allocation3 + $0x100] ss:$8 sps:$4 sm:$0xff]   ;;  %v2988_v48 = vld [vmem:[#allocation3 + $0x10] ss:$8 sps:$4 sm:$0xff]  }
 0xb79   :  { %2455 = vmatpush1.bf16.msra.mxu0 %v2991_v2  ;;  %2414 = vmatpush1.bf16.msra.mxu1 %v2988_v48  ;;  %v3024_v24 = vld [vmem:[#allocation3 + $0x70] ss:$8 sps:$4 sm:$0xff]  }
 0xb7a   :  { %2456 = vmatprep.subr.bf16.mxu0 %v2999_v12  ;;  %2415 = vmatprep.subr.bf16.mxu1 %v2996_v44 }
 0xb7d   :  { %2457 = vmatpush1.bf16.msra.mxu0 %v2997_v21  ;;  %2416 = vmatpush1.bf16.msra.mxu1 %v2994_v31 }
 0xb7e   :  { %2458 = vmatprep.subr.bf16.mxu0 %v3005_v11  ;;  %2417 = vmatprep.subr.bf16.mxu1 %v3002_v60 }
 0xb81   :  { %2459 = vmatpush1.bf16.msra.mxu0 %v3003_v22  ;;  %2418 = vmatpush1.bf16.msra.mxu1 %v3000_v43 }
 0xb82   :  { %2460 = vmatprep.subr.bf16.mxu0 %v3011_v25  ;;  %2419 = vmatprep.subr.bf16.mxu1 %v3008_v14 }
 0xb85   :  { %2461 = vmatpush1.bf16.msra.mxu0 %v3009_v41  ;;  %2420 = vmatpush1.bf16.msra.mxu1 %v3006_v33 }
 0xb86   :  { %2462 = vmatprep.subr.bf16.mxu0 %v3017_v34  ;;  %2421 = vmatprep.subr.bf16.mxu1 %v3014_v28 }
 0xb89   :  { %2463 = vmatpush1.bf16.msra.mxu0 %v3015_v63  ;;  %2422 = vmatpush1.bf16.msra.mxu1 %v3012_v29 }
 0xb8a   :  { %2464 = vmatprep.subr.bf16.mxu0 %v3023_v37  ;;  %2423 = vmatprep.subr.bf16.mxu1 %v3020_v56 }
 0xb8d   :  { %2465 = vmatpush1.bf16.msra.mxu0 %v3021_v7 }
 0xb8e   :  { %2466 = vmatprep.subr.bf16.mxu0 %v3029_v3 }
 0xbe6   :  { %v1575_v62 = vpop.permute.xlu0 %1574 }
 0xbe7   :  { %v1577_v23 = vsub.f32 %v1196_v8, %v1575_v62  ;;  %v3018_v8 = vld [vmem:[#allocation3 + $0x60] ss:$8 sps:$4 sm:$0xff]   ;;  %v3026_v62 = vld [vmem:[#allocation3 + $0x74] ss:$8 sps:$4 sm:$0xff]  }
 0xbe8   :  { %2424 = vmatpush1.bf16.msra.mxu1 %v3018_v8 }
 0xbe9   :  { %v1599_v55 = vrot.slane %v1577_v23, %v3619_v30  ;;  %v3027_v23 = vld [vmem:[#allocation3 + $0x160] ss:$8 sps:$4 sm:$0xff]   ;;  %2425 = vmatprep.subr.bf16.mxu1 %v3026_v62 }
 0xbea   :  { %2467 = vmatpush1.bf16.msra.mxu0 %v3027_v23 }
 0xbeb   :  { %1601 = vrot.lane.b32.xlu0 %v1599_v55, %s3143_s2  ;;  %v3035_v55 = vld [vmem:[#allocation3 + $0x174] ss:$8 sps:$4 sm:$0xff]  }
 0xbec   :  { %2468 = vmatprep.subr.bf16.mxu0 %v3035_v55  ;;  %2426 = vmatpush1.bf16.msra.mxu1 %v3024_v24 }
 0xc5d   :  { %v1602_v15 = vpop.permute.xlu0 %1601 }
 0xc5e   :  { %v1606_v49 = vadd.f32 %v1602_v15, %v1588_v59  ;;  %v1605_v5 = vadd.f32 %v1602_v15, %v1587_v9  ;;  %v1607_v57 = vadd.f32 %v1602_v15, %v1589_v10  ;;  %v1604_v58 = vadd.f32 %v1602_v15, %v1586_v52  ;;  %v3032_v59 = vld [vmem:[#allocation3 + $0x84] ss:$8 sps:$4 sm:$0xff]   ;;  %v3033_v9 = vld [vmem:[#allocation3 + $0x170] ss:$8 sps:$4 sm:$0xff]   ;;  %v3039_v10 = vld [vmem:[#allocation3 + $0x180] ss:$8 sps:$4 sm:$0xff]  }
 0xc5f   :  { %v1609_v13 = vadd.f32 %v1602_v15, %v1591_v46  ;;  %v1608_v4 = vadd.f32 %v1602_v15, %v1590_v1  ;;  %v1611_v35 = vadd.f32 %v1602_v15, %v1593_v26  ;;  %v1610_v38 = vadd.f32 %v1602_v15, %v1592_v18  ;;  %2427 = vmatprep.subr.bf16.mxu1 %v3032_v59  ;;  %v3047_v52 = vld [vmem:[#allocation3 + $0x194] ss:$8 sps:$4 sm:$0xff]   ;;  %v3042_v46 = vld [vmem:[#allocation3 + $0xa0] ss:$8 sps:$4 sm:$0xff]   ;;  %v3057_v26 = vld [vmem:[#allocation3 + $0x1b0] ss:$8 sps:$4 sm:$0xff]  }
 0xc60   :  { %v1616_v0 = vmax.f32 %v1606_v49, 0.0  ;;  %v1615_v42 = vmax.f32 %v1605_v5, 0.0  ;;  %v1617_v47 = vmax.f32 %v1607_v57, 0.0  ;;  %v1614_v53 = vmax.f32 %v1604_v58, 0.0  ;;  %v3030_v49 = vld [vmem:[#allocation3 + $0x80] ss:$8 sps:$4 sm:$0xff]   ;;  %2469 = vmatpush1.bf16.msra.mxu0 %v3033_v9 }
 0xc61   :  { %v1619_v17 = vmax.f32 %v1609_v13, 0.0  ;;  %v1618_v27 = vmax.f32 %v1608_v4, 0.0  ;;  %v1621_v39 = vmax.f32 %v1611_v35, 0.0  ;;  %v1620_v40 = vmax.f32 %v1610_v38, 0.0  ;;  %v3038_v5 = vld [vmem:[#allocation3 + $0x94] ss:$8 sps:$4 sm:$0xff]   ;;  %2428 = vmatpush1.bf16.msra.mxu1 %v3030_v49 }
 0xc62   :  { %1638 = vrot.lane.b32.xlu0 %v1616_v0, %s3143_s2  ;;  %1636 = vrot.lane.b32.xlu1 %v1615_v42, %s3143_s2  ;;  %v1612_v51 = vadd.f32 %v1602_v15, %v1594_v45  ;;  %v1613_v6 = vadd.f32 %v1602_v15, %v1595_v20  ;;  %v3041_v15 = vld [vmem:[#allocation3 + $0x184] ss:$8 sps:$4 sm:$0xff]   ;;  %v3036_v0 = vld [vmem:[#allocation3 + $0x90] ss:$8 sps:$4 sm:$0xff]   ;;  %v3050_v1 = vld [vmem:[#allocation3 + $0xb4] ss:$8 sps:$4 sm:$0xff]  }
 0xc63   :  { %2470 = vmatprep.subr.bf16.mxu0 %v3041_v15  ;;  %2429 = vmatprep.subr.bf16.mxu1 %v3038_v5  ;;  %v3044_v42 = vld [vmem:[#allocation3 + $0xa4] ss:$8 sps:$4 sm:$0xff]   ;;  %v3045_v57 = vld [vmem:[#allocation3 + $0x190] ss:$8 sps:$4 sm:$0xff]   ;;  %v3063_v35 = vld [vmem:[#allocation3 + $0x1c0] ss:$8 sps:$4 sm:$0xff]  }
 0xc64   :  { %v1622_v50 = vmax.f32 %v1612_v51, 0.0  ;;  %v1623_v32 = vmax.f32 %v1613_v6, 0.0  ;;  %2471 = vmatpush1.bf16.msra.mxu0 %v3039_v10  ;;  %v3053_v58 = vld [vmem:[#allocation3 + $0x1a4] ss:$8 sps:$4 sm:$0xff]   ;;  %v3048_v13 = vld [vmem:[#allocation3 + $0xb0] ss:$8 sps:$4 sm:$0xff]  }
 0xc65   :  { %2472 = vmatprep.subr.bf16.mxu0 %v3047_v52  ;;  %2430 = vmatpush1.bf16.msra.mxu1 %v3036_v0  ;;  %v3056_v4 = vld [vmem:[#allocation3 + $0xc4] ss:$8 sps:$4 sm:$0xff]   ;;  %v3071_v38 = vld [vmem:[#allocation3 + $0x1d4] ss:$8 sps:$4 sm:$0xff]   ;;  %v3060_v45 = vld [vmem:[#allocation3 + $0xd0] ss:$8 sps:$4 sm:$0xff]  }
 0xc66   :  { %1640 = vrot.lane.b32.xlu0 %v1617_v47, %s3143_s2  ;;  %1634 = vrot.lane.b32.xlu1 %v1614_v53, %s3143_s2  ;;  %v3051_v47 = vld [vmem:[#allocation3 + $0x1a0] ss:$8 sps:$4 sm:$0xff]   ;;  %v3059_v53 = vld [vmem:[#allocation3 + $0x1b4] ss:$8 sps:$4 sm:$0xff]   ;;  %v3065_v18 = vld [vmem:[#allocation3 + $0x1c4] ss:$8 sps:$4 sm:$0xff]  }
 0xc67   :  { %2431 = vmatprep.subr.bf16.mxu1 %v3044_v42  ;;  %v3068_v20 = vld [vmem:[#allocation3 + $0xe4] ss:$8 sps:$4 sm:$0xff]  }
 0xc68   :  { %2473 = vmatpush1.bf16.msra.mxu0 %v3045_v57 }
 0xc69   :  { %2474 = vmatprep.subr.bf16.mxu0 %v3053_v58  ;;  %2432 = vmatpush1.bf16.msra.mxu1 %v3042_v46 }
 0xc6a   :  { %1644 = vrot.lane.b32.xlu0 %v1619_v17, %s3143_s2  ;;  %1642 = vrot.lane.b32.xlu1 %v1618_v27, %s3143_s2  ;;  %v3054_v17 = vld [vmem:[#allocation3 + $0xc0] ss:$8 sps:$4 sm:$0xff]   ;;  %v3062_v27 = vld [vmem:[#allocation3 + $0xd4] ss:$8 sps:$4 sm:$0xff]  }
 0xc6b   :  { %2433 = vmatprep.subr.bf16.mxu1 %v3050_v1 }
 0xc6c   :  { %2475 = vmatpush1.bf16.msra.mxu0 %v3051_v47 }
 0xc6d   :  { %2476 = vmatprep.subr.bf16.mxu0 %v3059_v53  ;;  %2434 = vmatpush1.bf16.msra.mxu1 %v3048_v13 }
 0xc6e   :  { %1648 = vrot.lane.b32.xlu0 %v1621_v39, %s3143_s2  ;;  %1646 = vrot.lane.b32.xlu1 %v1620_v40, %s3143_s2  ;;  %v3069_v39 = vld [vmem:[#allocation3 + $0x1d0] ss:$8 sps:$4 sm:$0xff]   ;;  %v3066_v40 = vld [vmem:[#allocation3 + $0xe0] ss:$8 sps:$4 sm:$0xff]  }
 0xc6f   :  { %2435 = vmatprep.subr.bf16.mxu1 %v3056_v4 }
 0xc70   :  { %2477 = vmatpush1.bf16.msra.mxu0 %v3057_v26 }
 0xc71   :  { %2478 = vmatprep.subr.bf16.mxu0 %v3065_v18  ;;  %2436 = vmatpush1.bf16.msra.mxu1 %v3054_v17 }
 0xc72   :  { %1650 = vrot.lane.b32.xlu0 %v1622_v50, %s3143_s2  ;;  %1652 = vrot.lane.b32.xlu1 %v1623_v32, %s3143_s2 }
 0xc73   :  { %2437 = vmatprep.subr.bf16.mxu1 %v3062_v27 }
 0xc74   :  { %2479 = vmatpush1.bf16.msra.mxu0 %v3063_v35 }
 0xc75   :  { %2480 = vmatprep.subr.bf16.mxu0 %v3071_v38  ;;  %2438 = vmatpush1.bf16.msra.mxu1 %v3060_v45 }
 0xc76   :  { %2439 = vmatprep.subr.bf16.mxu1 %v3068_v20 }
 0xc78   :  { %2481 = vmatpush1.bf16.msra.mxu0 %v3069_v39 }
 0xc79   :  { %2440 = vmatpush1.bf16.msra.mxu1 %v3066_v40 }
 0xcd4   :  { %v1639_v51 = vpop.permute.xlu0 %1638  ;;  %v1637_v6 = vpop.permute.xlu1 %1636 }
 0xcd5   :  { %1667 = vst.msk [vmem:[#allocation2 + $0x10] sm:$0xff] %vm1664_vm10, %v1639_v51  ;;  %1666 = vst.msk [vmem:[#allocation2 + $0x8] sm:$0xff] %vm1664_vm10, %v1637_v6 }
 0xcd8   :  { %v1641_v50 = vpop.permute.xlu0 %1640  ;;  %v1635_v32 = vpop.permute.xlu1 %1634 }
 0xcd9   :  { %1668 = vst.msk [vmem:[#allocation2 + $0x18] sm:$0xff] %vm1664_vm10, %v1641_v50  ;;  %1665 = vst.msk [vmem:[#allocation2] sm:$0xff] %vm1664_vm10, %v1635_v32 }
 0xcdc   :  { %v1645_v19 = vpop.permute.xlu0 %1644  ;;  %v1643_v54 = vpop.permute.xlu1 %1642  ;;  %v1706_v36 = vld [vmem:[#allocation2 + $0xb] sm:$0x1]  ;;  %v1707_v2 = vld [vmem:[#allocation2 + $0x13] sm:$0x1]  ;;  %v1686_v61 = vld [vmem:[#allocation2 + $0x9] sm:$0x1] }
 0xcdd   :  { %1670 = vst.msk [vmem:[#allocation2 + $0x28] sm:$0xff] %vm1664_vm10, %v1645_v19  ;;  %1669 = vst.msk [vmem:[#allocation2 + $0x20] sm:$0xff] %vm1664_vm10, %v1643_v54  ;;  %v1860_v48 = vrot.slane %v1706_v36, 7  ;;  %v1862_v12 = vrot.slane %v1707_v2, 6  ;;  %v1687_v44 = vld [vmem:[#allocation2 + $0x11] sm:$0x1] }
 0xcde   :  { %v1746_v21 = vld [vmem:[#allocation2 + $0xf] sm:$0x1]  ;;  %v1800_v11 = vrot.slane %v1686_v61, 7  ;;  %v1747_v31 = vld [vmem:[#allocation2 + $0x17] sm:$0x1]  ;;  %v1802_v29 = vrot.slane %v1687_v44, 6 }
 0xcdf   :  { %v1980_v60 = vrot.slane %v1746_v21, 7  ;;  %v1726_v22 = vld [vmem:[#allocation2 + $0xd] sm:$0x1]  ;;  %v1982_v23 = vrot.slane %v1747_v31, 6  ;;  %v1727_v9 = vld [vmem:[#allocation2 + $0x15] sm:$0x1] }
 0xce0   :  { %v1649_v25 = vpop.permute.xlu0 %1648  ;;  %v1647_v43 = vpop.permute.xlu1 %1646  ;;  %v1705_v14 = vld [vmem:[#allocation2 + $0x3] sm:$0x1]  ;;  %v1708_v41 = vld [vmem:[#allocation2 + $0x1b] sm:$0x1]  ;;  %v1685_v34 = vld [vmem:[#allocation2 + $0x1] sm:$0x1] }
 0xce1   :  { %1672 = vst.msk [vmem:[#allocation2 + $0x38] sm:$0xff] %vm1664_vm10, %v1649_v25  ;;  %1671 = vst.msk [vmem:[#allocation2 + $0x30] sm:$0xff] %vm1664_vm10, %v1647_v43  ;;  %v1861_v33 = vsel %vm1766_vm13, %v1860_v48, %v1705_v14  ;;  %v1864_v28 = vrot.slane %v1708_v41, 5  ;;  %v1688_v63 = vld [vmem:[#allocation2 + $0x19] sm:$0x1]  ;;  %v1801_v37 = vsel %vm1766_vm13, %v1800_v11, %v1685_v34  ;;  %v1920_v15 = vrot.slane %v1726_v22, 7 }
 0xce2   :  { %v1745_v56 = vld [vmem:[#allocation2 + $0x7] sm:$0x1]  ;;  %v1863_v7 = vsel %vm1769_vm14, %v1862_v12, %v1861_v33  ;;  %v1804_v3 = vrot.slane %v1688_v63, 5  ;;  %v1748_v8 = vld [vmem:[#allocation2 + $0x1f] sm:$0x1]  ;;  %v1803_v55 = vsel %vm1769_vm14, %v1802_v29, %v1801_v37  ;;  %v1922_v17 = vrot.slane %v1727_v9, 6 }
 0xce3   :  { %v1981_v62 = vsel %vm1766_vm13, %v1980_v60, %v1745_v56  ;;  %v1984_v24 = vrot.slane %v1748_v8, 5  ;;  %v1725_v59 = vld [vmem:[#allocation2 + $0x5] sm:$0x1]  ;;  %v1865_v0 = vsel %vm1772_vm15, %v1864_v28, %v1863_v7  ;;  %v1728_v20 = vld [vmem:[#allocation2 + $0x1d] sm:$0x1] }
 0xce4   :  { %v1651_v49 = vpop.permute.xlu0 %1650  ;;  %v1653_v5 = vpop.permute.xlu1 %1652  ;;  %v1709_v10 = vld [vmem:[#allocation2 + $0x23] sm:$0x1]  ;;  %v1710_v52 = vld [vmem:[#allocation2 + $0x2b] sm:$0x1]  ;;  %v1689_v42 = vld [vmem:[#allocation2 + $0x21] sm:$0x1]  ;;  %v1983_v47 = vsel %vm1769_vm14, %v1982_v23, %v1981_v62  ;;  %v1805_v53 = vsel %vm1772_vm15, %v1804_v3, %v1803_v55  ;;  %v1921_v18 = vsel %vm1766_vm13, %v1920_v15, %v1725_v59 }
 0xce5   :  { %1673 = vst.msk [vmem:[#allocation2 + $0x40] sm:$0xff] %vm1664_vm10, %v1651_v49  ;;  %1674 = vst.msk [vmem:[#allocation2 + $0x48] sm:$0xff] %vm1664_vm10, %v1653_v5  ;;  %v1866_v57 = vrot.slane %v1709_v10, 4  ;;  %v1868_v58 = vrot.slane %v1710_v52, 3  ;;  %v1690_v46 = vld [vmem:[#allocation2 + $0x29] sm:$0x1]  ;;  %v1985_v50 = vsel %vm1772_vm15, %v1984_v24, %v1983_v47  ;;  %v1923_v11 = vsel %vm1769_vm14, %v1922_v17, %v1921_v18 }
 0xce6   :  { %v1806_v1 = vrot.slane %v1689_v42, 4  ;;  %v1808_v13 = vrot.slane %v1690_v46, 3  ;;  %v1749_v4 = vld [vmem:[#allocation2 + $0x27] sm:$0x1]  ;;  %v1750_v26 = vld [vmem:[#allocation2 + $0x2f] sm:$0x1] }
 0xce7   :  { %v1867_v27 = vsel %vm1775_vm2, %v1866_v57, %v1865_v0  ;;  %v1986_v38 = vrot.slane %v1749_v4, 4  ;;  %v1988_v45 = vrot.slane %v1750_v26, 3  ;;  %v1729_v32 = vld [vmem:[#allocation2 + $0x25] sm:$0x1]  ;;  %v1924_v31 = vrot.slane %v1728_v20, 5 }
 0xce8   :  { %v1807_v35 = vsel %vm1775_vm2, %v1806_v1, %v1805_v53  ;;  %v1711_v39 = vld [vmem:[#allocation2 + $0x33] sm:$0x1]  ;;  %v1712_v40 = vld [vmem:[#allocation2 + $0x3b] sm:$0x1]  ;;  %v1869_v51 = vsel %vm1778_vm3, %v1868_v58, %v1867_v27  ;;  %v1691_v6 = vld [vmem:[#allocation2 + $0x31] sm:$0x1] }
 0xce9   :  { %v1870_v19 = vrot.slane %v1711_v39, 2  ;;  %v1872_v54 = vrot.slane %v1712_v40, 1  ;;  %v1692_v36 = vld [vmem:[#allocation2 + $0x39] sm:$0x1]  ;;  %v1810_v2 = vrot.slane %v1691_v6, 2  ;;  %v1987_v61 = vsel %vm1775_vm2, %v1986_v38, %v1985_v50 }
 0xcea   :  { %v1809_v48 = vsel %vm1778_vm3, %v1808_v13, %v1807_v35  ;;  %v1812_v12 = vrot.slane %v1692_v36, 1  ;;  %v1751_v44 = vld [vmem:[#allocation2 + $0x37] sm:$0x1]  ;;  %v1752_v21 = vld [vmem:[#allocation2 + $0x3f] sm:$0x1]  ;;  %v1989_v34 = vsel %vm1778_vm3, %v1988_v45, %v1987_v61  ;;  %v1926_v3 = vrot.slane %v1729_v32, 4 }
 0xceb   :  { %v1871_v60 = vsel %vm1781_vm4, %v1870_v19, %v1869_v51  ;;  %v1811_v22 = vsel %vm1781_vm4, %v1810_v2, %v1809_v48  ;;  %v1990_v25 = vrot.slane %v1751_v44, 2  ;;  %v1992_v43 = vrot.slane %v1752_v21, 1  ;;  %v1730_v14 = vld [vmem:[#allocation2 + $0x2d] sm:$0x1]  ;;  %v1731_v33 = vld [vmem:[#allocation2 + $0x35] sm:$0x1] }
 0xcec   :  { %v1714_v41 = vld [vmem:[#allocation2 + $0x4b] sm:$0x1]  ;;  %v1732_v28 = vld [vmem:[#allocation2 + $0x3d] sm:$0x1]  ;;  %v1713_v63 = vld [vmem:[#allocation2 + $0x43] sm:$0x1]  ;;  %v1873_v37 = vsel %vm1784_vm5, %v1872_v54, %v1871_v60  ;;  %v1813_v7 = vsel %vm1784_vm5, %v1812_v12, %v1811_v22  ;;  %v1925_v24 = vsel %vm1772_vm15, %v1924_v31, %v1923_v11 }
 0xced   :  { %v1874_v29 = vrot.slane %v1714_v41, 7  ;;  %v1694_v56 = vld [vmem:[#allocation2 + $0x49] sm:$0x1]  ;;  %v1693_v8 = vld [vmem:[#allocation2 + $0x41] sm:$0x1]  ;;  %v1991_v55 = vsel %vm1781_vm4, %v1990_v25, %v1989_v34  ;;  %v1928_v59 = vrot.slane %v1730_v14, 3  ;;  %v1927_v10 = vsel %vm1775_vm2, %v1926_v3, %v1925_v24 }
 0xcee   :  { %v1814_v62 = vrot.slane %v1694_v56, 7  ;;  %v1754_v23 = vld [vmem:[#allocation2 + $0x4f] sm:$0x1]  ;;  %v1753_v15 = vld [vmem:[#allocation2 + $0x47] sm:$0x1]  ;;  %v1930_v52 = vrot.slane %v1731_v33, 2  ;;  %v1993_v38 = vsel %vm1784_vm5, %v1992_v43, %v1991_v55 }
 0xcef   :  { %v1875_v9 = vsel %vm1766_vm13, %v1874_v29, %v1713_v63  ;;  %v1994_v49 = vrot.slane %v1754_v23, 7  ;;  %v1734_v5 = vld [vmem:[#allocation2 + $0x4d] sm:$0x1]  ;;  %v1929_v57 = vsel %vm1778_vm3, %v1928_v59, %v1927_v10  ;;  %v1932_v58 = vrot.slane %v1732_v28, 1  ;;  %v1676_v46 = vld [vmem:[#allocation2 + $0x8] sm:$0x1] }
 0xcf0   :  { %v2943_v0 = vpack.i.bf16 %v1875_v9, %v1873_v37  ;;  %v1815_v42 = vsel %vm1766_vm13, %v1814_v62, %v1693_v8  ;;  %v1678_v1 = vld [vmem:[#allocation2 + $0x18] sm:$0x1]  ;;  %v1931_v13 = vsel %vm1781_vm4, %v1930_v52, %v1929_v57  ;;  %v1934_v4 = vrot.slane %v1734_v5, 7  ;;  %v1677_v26 = vld [vmem:[#allocation2 + $0x10] sm:$0x1] }
 0xcf1   :  { %v2948_v47 = vpack.i.bf16 %v1815_v42, %v1813_v7  ;;  %v1995_v53 = vsel %vm1766_vm13, %v1994_v49, %v1753_v15  ;;  %v1679_v18 = vld [vmem:[#allocation2 + $0x20] sm:$0x1]  ;;  %v1733_v17 = vld [vmem:[#allocation2 + $0x45] sm:$0x1]  ;;  %v1680_v35 = vld [vmem:[#allocation2 + $0x28] sm:$0x1]  ;;  %v1933_v50 = vsel %vm1784_vm5, %v1932_v58, %v1931_v13 }
 0xcf2   :  { %2944 = vrot.lane.b32.xlu1 %v2943_v0, %s3143_s2  ;;  %v1675_v27 = vld [vmem:[#allocation2] sm:$0x1]  ;;  %v1935_v45 = vsel %vm1766_vm13, %v1934_v4, %v1733_v17  ;;  %v1681_v20 = vld [vmem:[#allocation2 + $0x30] sm:$0x1]  ;;  %v1682_v39 = vld [vmem:[#allocation2 + $0x38] sm:$0x1]  ;;  %v2953_v6 = vpack.i.bf16 %v1995_v53, %v1993_v38 }
 0xcf3   :  { %2949 = vrot.lane.b32.xlu0 %v2948_v47, %s3143_s2  ;;  %v1765_v40 = vrot.slane %v1676_v46, 7  ;;  %v1771_v51 = vrot.slane %v1678_v1, 5  ;;  %v1768_v32 = vrot.slane %v1677_v26, 6  ;;  %v1774_v19 = vrot.slane %v1679_v18, 4  ;;  %v3072_v54 = vld [vmem:[#allocation3 + $0xf0] ss:$8 sps:$4 sm:$0xff]  }
 0xcf4   :  { %v2958_v36 = vpack.i.bf16 %v1935_v45, %v1933_v50  ;;  %v1777_v61 = vrot.slane %v1680_v35, 3  ;;  %v3074_v48 = vld [vmem:[#allocation3 + $0xf4] ss:$8 sps:$4 sm:$0xff]   ;;  %v3075_v12 = vld [vmem:[#allocation3 + $0x1e0] ss:$8 sps:$4 sm:$0xff]   ;;  %v1780_v21 = vrot.slane %v1681_v20, 2 }
 0xcf5   :  { %v1767_v2 = vsel %vm1766_vm13, %v1765_v40, %v1675_v27  ;;  %v1783_v11 = vrot.slane %v1682_v39, 1  ;;  %v3077_v31 = vld [vmem:[#allocation3 + $0x1e4] ss:$8 sps:$4 sm:$0xff]   ;;  %v1716_v60 = vld [vmem:[#allocation2 + $0xc] sm:$0x1]  ;;  %2441 = vmatprep.subr.bf16.mxu1 %v3074_v48 }
 0xcf6   :  { %2954 = vrot.lane.b32.xlu1 %v2953_v6, %s3143_s2  ;;  %v1770_v44 = vsel %vm1769_vm14, %v1768_v32, %v1767_v2  ;;  %v1717_v25 = vld [vmem:[#allocation2 + $0x14] sm:$0x1]  ;;  %v1718_v43 = vld [vmem:[#allocation2 + $0x1c] sm:$0x1]  ;;  %v1719_v14 = vld [vmem:[#allocation2 + $0x24] sm:$0x1]  ;;  %2482 = vmatprep.subr.bf16.mxu0 %v3077_v31 }
 0xcf7   :  { %2959 = vrot.lane.b32.xlu0 %v2958_v36, %s3143_s2  ;;  %v1773_v22 = vsel %vm1772_vm15, %v1771_v51, %v1770_v44  ;;  %2442 = vmatpush1.bf16.msra.mxu1 %v3072_v54  ;;  %v1715_v34 = vld [vmem:[#allocation2 + $0x4] sm:$0x1]  ;;  %v1720_v33 = vld [vmem:[#allocation2 + $0x2c] sm:$0x1]  ;;  %v1721_v63 = vld [vmem:[#allocation2 + $0x34] sm:$0x1] }
 0xcf8   :  { %v1776_v41 = vsel %vm1775_vm2, %v1774_v19, %v1773_v22  ;;  %2483 = vmatpush1.bf16.msra.mxu0 %v3075_v12  ;;  %v1892_v37 = vrot.slane %v1716_v60, 7  ;;  %v1894_v29 = vrot.slane %v1717_v25, 6  ;;  %v1722_v7 = vld [vmem:[#allocation2 + $0x3c] sm:$0x1]  ;;  %v1896_v3 = vrot.slane %v1718_v43, 5 }
 0xcf9   :  { %v1779_v28 = vsel %vm1778_vm3, %v1777_v61, %v1776_v41  ;;  %v1898_v8 = vrot.slane %v1719_v14, 4  ;;  %v1900_v62 = vrot.slane %v1720_v33, 3  ;;  %v1695_v24 = vld [vmem:[#allocation2 + $0x2] sm:$0x1]  ;;  %v1696_v59 = vld [vmem:[#allocation2 + $0xa] sm:$0x1] }
 0xcfa   :  { %v1782_v56 = vsel %vm1781_vm4, %v1780_v21, %v1779_v28  ;;  %v1893_v55 = vsel %vm1766_vm13, %v1892_v37, %v1715_v34  ;;  %v1697_v9 = vld [vmem:[#allocation2 + $0x12] sm:$0x1]  ;;  %v1902_v49 = vrot.slane %v1721_v63, 2  ;;  %v1698_v5 = vld [vmem:[#allocation2 + $0x1a] sm:$0x1]  ;;  %v1832_v52 = vrot.slane %v1696_v59, 7 }
 0xcfb   :  { %v4198_v23 = vsel %vm1784_vm5, %v1783_v11, %v1782_v56  ;;  %v1895_v15 = vsel %vm1769_vm14, %v1894_v29, %v1893_v55  ;;  %v1699_v10 = vld [vmem:[#allocation2 + $0x22] sm:$0x1]  ;;  %v1904_v42 = vrot.slane %v1722_v7, 1  ;;  %v1700_v57 = vld [vmem:[#allocation2 + $0x2a] sm:$0x1]  ;;  %v1834_v53 = vrot.slane %v1697_v9, 6 }
 0xcfc   :  { %v1897_v0 = vsel %vm1772_vm15, %v1896_v3, %v1895_v15  ;;  %v1701_v58 = vld [vmem:[#allocation2 + $0x32] sm:$0x1]  ;;  %v1702_v1 = vld [vmem:[#allocation2 + $0x3a] sm:$0x1]  ;;  %v1833_v47 = vsel %vm1766_vm13, %v1832_v52, %v1695_v24  ;;  %v1836_v4 = vrot.slane %v1698_v5, 5  ;;  %v1838_v26 = vrot.slane %v1699_v10, 4 }
 0xcfd   :  { %v1899_v46 = vsel %vm1775_vm2, %v1898_v8, %v1897_v0  ;;  %v1840_v18 = vrot.slane %v1700_v57, 3  ;;  %v3078_v17 = vld [vmem:[#allocation3 + $0x1f0] ss:$8 sps:$4 sm:$0xff]   ;;  %v1835_v35 = vsel %vm1769_vm14, %v1834_v53, %v1833_v47  ;;  %v1842_v38 = vrot.slane %v1701_v58, 2  ;;  %v3080_v45 = vld [vmem:[#allocation3 + $0x1f4] ss:$8 sps:$4 sm:$0xff]  }
 0xcfe   :  { %v1901_v13 = vsel %vm1778_vm3, %v1900_v62, %v1899_v46  ;;  %v3081_v20 = vld [vmem:[%s4305_s5 + $0x40] sm:$0xff]   ;;  %v1837_v40 = vsel %vm1772_vm15, %v1836_v4, %v1835_v35  ;;  %v1844_v51 = vrot.slane %v1702_v1, 1  ;;  %v1736_v6 = vld [vmem:[#allocation2 + $0xe] sm:$0x1]  ;;  %2484 = vmatprep.subr.bf16.mxu0 %v3080_v45  ;;  %v1737_v32 = vld [vmem:[#allocation2 + $0x16] sm:$0x1] }
 0xcff   :  { %v1903_v27 = vsel %vm1781_vm4, %v1902_v49, %v1901_v13  ;;  %v1839_v50 = vsel %vm1775_vm2, %v1838_v26, %v1837_v40  ;;  %v1738_v19 = vld [vmem:[#allocation2 + $0x1e] sm:$0x1]  ;;  %v1739_v54 = vld [vmem:[#allocation2 + $0x26] sm:$0x1]  ;;  %2485 = vmatpush1.bf16.msra.mxu0 %v3078_v17  ;;  %v1740_v61 = vld [vmem:[#allocation2 + $0x2e] sm:$0x1] }
 0xd00   :  { %v4212_v39 = vsel %vm1784_vm5, %v1904_v42, %v1903_v27  ;;  %v1841_v36 = vsel %vm1778_vm3, %v1840_v18, %v1839_v50  ;;  %v1735_v2 = vld [vmem:[#allocation2 + $0x6] sm:$0x1]  ;;  %v1741_v12 = vld [vmem:[#allocation2 + $0x36] sm:$0x1]  ;;  %v1952_v44 = vrot.slane %v1736_v6, 7  ;;  %v1956_v21 = vrot.slane %v1738_v19, 5  ;;  %2844 = vmatprep.subr.bf16.mxu0 %v3081_v20 }
 0xd01   :  { %v1843_v48 = vsel %vm1781_vm4, %v1842_v38, %v1841_v36  ;;  %v1742_v31 = vld [vmem:[#allocation2 + $0x3e] sm:$0x1]  ;;  %v1954_v60 = vrot.slane %v1737_v32, 6  ;;  %v1958_v22 = vrot.slane %v1739_v54, 4  ;;  %v1960_v43 = vrot.slane %v1740_v61, 3  ;;  %v3084_v61 = vld [vmem:[%s4305_s5 + $0x8] sm:$0xff]  }
 0xd02   :  { %v1845_v11 = vsel %vm1784_vm5, %v1844_v51, %v1843_v48  ;;  %v1953_v25 = vsel %vm1766_vm13, %v1952_v44, %v1735_v2  ;;  %v1962_v41 = vrot.slane %v1741_v12, 2  ;;  %v1964_v33 = vrot.slane %v1742_v31, 1  ;;  %v1704_v56 = vld [vmem:[#allocation2 + $0x4a] sm:$0x1]  ;;  %v1684_v7 = vld [vmem:[#allocation2 + $0x48] sm:$0x1] }
 0xd03   :  { %v1955_v14 = vsel %vm1769_vm14, %v1954_v60, %v1953_v25  ;;  %v1846_v3 = vrot.slane %v1704_v56, 7  ;;  %v1786_v8 = vrot.slane %v1684_v7, 7  ;;  %v1744_v62 = vld [vmem:[#allocation2 + $0x4e] sm:$0x1]  ;;  %v1724_v24 = vld [vmem:[#allocation2 + $0x4c] sm:$0x1] }
 0xd04   :  { %v1957_v34 = vsel %vm1772_vm15, %v1956_v21, %v1955_v14  ;;  %v1703_v49 = vld [vmem:[#allocation2 + $0x42] sm:$0x1]  ;;  %v1683_v5 = vld [vmem:[#allocation2 + $0x40] sm:$0x1]  ;;  %v1966_v42 = vrot.slane %v1744_v62, 7  ;;  %v1906_v58 = vrot.slane %v1724_v24, 7 }
 0xd05   :  { %v1959_v28 = vsel %vm1775_vm2, %v1958_v22, %v1957_v34  ;;  %v1847_v0 = vsel %vm1766_vm13, %v1846_v3, %v1703_v49  ;;  %v1787_v57 = vsel %vm1766_vm13, %v1786_v8, %v1683_v5  ;;  %v1743_v35 = vld [vmem:[#allocation2 + $0x46] sm:$0x1]  ;;  %v1723_v38 = vld [vmem:[#allocation2 + $0x44] sm:$0x1]  ;;  %v3082_v54 = vld [vmem:[%s4305_s5] sm:$0xff]  }
 0xd06   :  { %v1961_v63 = vsel %vm1778_vm3, %v1960_v43, %v1959_v28  ;;  %v1967_v40 = vsel %vm1766_vm13, %v1966_v42, %v1743_v35  ;;  %v1907_v51 = vsel %vm1766_vm13, %v1906_v58, %v1723_v38  ;;  %v3083_v2 = vld [vmem:[%s4305_s5 + $0x48] sm:$0xff]   ;;  %v3086_v48 = vld [vmem:[%s4305_s5 + $0x10] sm:$0xff]   ;;  %v3087_v12 = vld [vmem:[%s4305_s5 + $0x58] sm:$0xff]  }
 0xd07   :  { %v1963_v37 = vsel %vm1781_vm4, %v1962_v41, %v1961_v63  ;;  %v3088_v44 = vld [vmem:[%s4305_s5 + $0x18] sm:$0xff]   ;;  %v3089_v21 = vld [vmem:[%s4305_s5 + $0x60] sm:$0xff]   ;;  %v3091_v31 = vld [vmem:[%s4305_s5 + $0x68] sm:$0xff]  }
 0xd08   :  { %v1965_v29 = vsel %vm1784_vm5, %v1964_v33, %v1963_v37  ;;  %v3092_v60 = vld [vmem:[%s4305_s5 + $0x28] sm:$0xff]   ;;  %v3093_v22 = vld [vmem:[%s4305_s5 + $0x70] sm:$0xff]   ;;  %v3095_v43 = vld [vmem:[%s4305_s5 + $0x78] sm:$0xff]   ;;  %v2087_v33 = vsub.s32 1, %v3260_v16 }
 0xd09   :  { %v3094_v25 = vld [vmem:[%s4305_s5 + $0x30] sm:$0xff]   ;;  %v3096_v14 = vld [vmem:[%s4305_s5 + $0x38] sm:$0xff]   ;;  %v2535_v41 = vld [vmem:[%s4306_s6 + $0x7] ss:$0 sm:$0xff] }
 0xd0a   :  { %2538 = vperm.xlu1 %2963, %v2535_v41   ;;  %v2744_v34 = vld [vmem:[%s4306_s6 + $0x6] ss:$8 sm:$0x3] }
 0xd0b   :  { %v2084_v28 = vrot.slane %v2744_v34, %v3619_v30  ;;  %v2088_v37 = vrot.slane %v2744_v34, %v2087_v33 }
 0xd64   :  { %v2945_v55 = vpop.permute.xlu1 %2944 }
 0xd65   :  { %v2947_v59 = vunpack.i.h.bf16 %v2945_v55  ;;  %v2946_v9 = vunpack.i.l.bf16 %v2945_v55  ;;  %v2950_v15 = vpop.permute.xlu0 %2949 }
 0xd66   :  { %v2952_v10 = vunpack.i.h.bf16 %v2950_v15  ;;  %v2951_v52 = vunpack.i.l.bf16 %v2950_v15 }
 0xd67   :  { %v2004_v46 = vsel %vm1664_vm10, %v1845_v11, %v2946_v9  ;;  %v2005_v1 = vsel %vm1664_vm10, %v1847_v0, %v2947_v59  ;;  %v3090_v11 = vld [vmem:[%s4305_s5 + $0x20] sm:$0xff]  }
 0xd68   :  { %v2002_v47 = vsel %vm1664_vm10, %v4198_v23, %v2951_v52  ;;  %v2003_v53 = vsel %vm1664_vm10, %v1787_v57, %v2952_v10  ;;  %v2955_v13 = vpop.permute.xlu1 %2954  ;;  %v2011_v4 = vpack.c.bf16 %v2005_v1, %v2004_v46 }
 0xd69   :  { %v2010_v26 = vpack.c.bf16 %v2003_v53, %v2002_v47  ;;  %v2957_v18 = vunpack.i.h.bf16 %v2955_v13  ;;  %v2956_v17 = vunpack.i.l.bf16 %v2955_v13  ;;  %v2960_v27 = vpop.permute.xlu0 %2959 }
 0xd6a   :  { %v2962_v45 = vunpack.i.h.bf16 %v2960_v27  ;;  %v2961_v20 = vunpack.i.l.bf16 %v2960_v27  ;;  %2443 = vmatprep.mubr.bf16.mxu1 %v2011_v4 }
 0xd6b   :  { %2444 = vmatmul.mubr.bf16.vlgmr.msra.gmra.mrb[40].mxu1 %v2010_v26  ;;  %v2008_v23 = vsel %vm1664_vm10, %v1965_v29, %v2956_v17  ;;  %v2009_v6 = vsel %vm1664_vm10, %v1967_v40, %v2957_v18 }
 0xd6c   :  { %v2007_v50 = vsel %vm1664_vm10, %v1907_v51, %v2962_v45  ;;  %v2006_v32 = vsel %vm1664_vm10, %v4212_v39, %v2961_v20  ;;  %v2013_v19 = vpack.c.bf16 %v2009_v6, %v2008_v23  ;;  %v3085_v39 = vld [vmem:[%s4305_s5 + $0x50] sm:$0xff]  }
 0xd6d   :  { %v2012_v36 = vpack.c.bf16 %v2007_v50, %v2006_v32 }
 0xd6e   :  { %2486 = vmatprep.mubr.bf16.mxu0 %v2013_v19 }
 0xd6f   :  { %2487 = vmatmul.mubr.bf16.vlgmr.msra.gmra.mrb[20].mxu0 %v2012_v36 }
 0xd70   :  { %2845 = vmatpush3.bf16.msra.mxu0 %v3082_v54 }
 0xd71   :  { %2846 = vmatprep.subr.bf16.mxu0 %v3083_v2 }
 0xd74   :  { %2847 = vmatpush3.bf16.msra.mxu0 %v3084_v61 }
 0xd75   :  { %2848 = vmatprep.subr.bf16.mxu0 %v3085_v39 }
 0xd78   :  { %2849 = vmatpush3.bf16.msra.mxu0 %v3086_v48 }
 0xd79   :  { %2850 = vmatprep.subr.bf16.mxu0 %v3087_v12 }
 0xd7c   :  { %2851 = vmatpush3.bf16.msra.mxu0 %v3088_v44 }
 0xd7d   :  { %2852 = vmatprep.subr.bf16.mxu0 %v3089_v21 }
 0xd80   :  { %2853 = vmatpush3.bf16.msra.mxu0 %v3090_v11 }
 0xd81   :  { %2854 = vmatprep.subr.bf16.mxu0 %v3091_v31 }
 0xd84   :  { %2855 = vmatpush3.bf16.msra.mxu0 %v3092_v60 }
 0xd85   :  { %2856 = vmatprep.subr.bf16.mxu0 %v3093_v22 }
 0xd88   :  { %2857 = vmatpush3.bf16.msra.mxu0 %v3094_v25 }
 0xd89   :  { %2858 = vmatprep.subr.bf16.mxu0 %v3095_v43  ;;  %v2539_v47 = vpop.permute.xlu1 %2538 }
 0xd8c   :  { %2859 = vmatpush3.bf16.msra.mxu0 %v3096_v14 }
 0xe3e   :  { %v2445_v63 = vpop.f32.mrb[40].mxu1 }
 0xe3f   :  { %v2447_v29 = vpop.f32.mrb[41].mxu1  ;;  %v2446_v7 = vadd.f32 %v2445_v63, %v2084_v28 }
 0xe40   :  { %v2449_v56 = vpop.f32.mrb[42].mxu1  ;;  %v2448_v8 = vadd.f32 %v2447_v29, %v2088_v37 }
 0xe41   :  { %v2451_v3 = vpop.f32.mrb[43].mxu1  ;;  %v2450_v55 = vadd.f32 %v2449_v56, %v2084_v28 }
 0xe42   :  { %v2488_v62 = vpop.f32.mrb[20].mxu0  ;;  %v2452_v9 = vadd.f32 %v2451_v3, %v2088_v37 }
 0xe43   :  { %v2489_v24 = vadd.f32 %v2488_v62, %v2446_v7  ;;  %v2490_v59 = vpop.f32.mrb[21].mxu0 }
 0xe44   :  { %v2491_v15 = vadd.f32 %v2490_v59, %v2448_v8  ;;  %v2492_v49 = vpop.f32.mrb[22].mxu0 }
 0xe45   :  { %v2493_v5 = vadd.f32 %v2492_v49, %v2450_v55  ;;  %v2494_v10 = vpop.f32.mrb[23].mxu0  ;;  %v2497_v16 = vmax.f32 %v2489_v24, 0.0 }
 0xe46   :  { %v2495_v52 = vadd.f32 %v2494_v10, %v2452_v9  ;;  %v2498_v30 = vmax.f32 %v2491_v15, 0.0 }
 0xe47   :  { %v2499_v0 = vmax.f32 %v2493_v5, 0.0 }
 0xe48   :  { %v2500_v42 = vmax.f32 %v2495_v52, 0.0 }
 0xe49   :  { %v2501_v57 = vpack.c.bf16 %v2499_v0, %v2497_v16 }
 0xe4a   :  { %v2502_v58 = vpack.c.bf16 %v2500_v42, %v2498_v30 }
 0xe4c   :  { %2669 = vmatprep.mubr.bf16.mxu0 %v2502_v58 }
 0xe4d   :  { %2670 = vmatmul.mubr.bf16.vlgmr.msra.gmra.mrb[24].mxu0 %v2501_v57 }
 0xf20   :  { %v2860_v46 = vpop.f32.mrb[24].mxu0 }
 0xf21   :  { %v2861_v1 = vpop.f32.mrb[25].mxu0 }
 0xf22   :  { %v2862_v53 = vadd.f32 %v2861_v1, %v2860_v46  ;;  %v2863_v13 = vpop.f32.mrb[26].mxu0 }
 0xf23   :  { %v2864_v4 = vpop.f32.mrb[27].mxu0 }
 0xf24   :  { %v2672_v26 = vadd.f32 %v2862_v53, %v2539_v47  ;;  %v2865_v18 = vadd.f32 %v2864_v4, %v2863_v13 }
 0xf26   :  { %v2678_v17 = vsub.f32 0.0, %v2672_v26  ;;  %v2675_v27 = vadd.f32 %v2865_v18, %v2539_v47 }
 0xf28   :  { %v2680_v35 = vmul.f32 1.442695, %v2678_v17  ;;  %v2679_v38 = vsub.f32 0.0, %v2675_v27 }
 0xf2a   :  { %3103 = vpow2.f32 %v2680_v35  ;;  %v2682_v45 = vmul.f32 1.442695, %v2679_v38 }
 0xf2c   :  { %3105 = vpow2.f32 %v2682_v45 }
 0xf34   :  { %v3104_v20 = vpop.eup %3103 }
 0xf35   :  { %v2684_v40 = vadd.f32 1.0, %v3104_v20 }
 0xf36   :  { %v3106_v51 = vpop.eup %3105 }
 0xf37   :  { %3107 = vrcp.f32 %v2684_v40  ;;  %v2685_v23 = vadd.f32 1.0, %v3106_v51 }
 0xf39   :  { %3109 = vrcp.f32 %v2685_v23 }
 0xf41   :  { %v3108_v6 = vpop.eup %3107 }
 0xf42   :  { %2688 = vst.msk [vmem:[%s4307_s7] sm:$0xff] %vm772_vm11, %v3108_v6 }
 0xf43   :  { %v3110_v50 = vpop.eup %3109 }
 0xf44   :  { %2690 = vst.msk [vmem:[%s4307_s7 + $0x8] sm:$0x3] %vm2689_vm6, %v3110_v50 }
 0xf45   :  { %2695 = vsyncpa [#allocation4], 1 }

</bundles_post_ra>
